<compile_context>
chip_gen: v6e
topology: v6e:2x2x1
jax: 0.10.0
libtpu: 0.0.40
codegen_flags: <defaults>
</compile_context>

<pallas_src>
import math

import jax
import jax.numpy as jnp
import numpy as np
from jax.experimental import pallas as pl
from jax.experimental.pallas import tpu as pltpu

LN_EPS = 1e-5


# ----------------------------------------------------------------------------- kernel helpers
def _layernorm(x, w, b):
    # x: (B, T, D), w/b: (1, D).  Matches torch.nn.LayerNorm (biased var, eps=1e-5).
    mu = jnp.mean(x, axis=-1, keepdims=True)
    xc = x - mu
    var = jnp.mean(xc * xc, axis=-1, keepdims=True)
    return xc * jax.lax.rsqrt(var + LN_EPS) * w + b


def _time_shift(x):
    # last[:, 0] = 0, last[:, t] = x[:, t-1]  (per-batch shift along T).
    b, t, d = x.shape
    zero = jnp.zeros((b, 1, d), x.dtype)
    if t == 1:
        return zero
    return jnp.concatenate([zero, x[:, : t - 1, :]], axis=1)


# ----------------------------------------------------------------------------- fused RwkvStack kernel
def rwkv_stack_kernel(
    x_ref,        # (B, T, D)   input activations (constant block -> resident in VMEM)
    vecs_ref,     # (1, 8, D)   ln0_w, ln0_b, ln1_w, ln1_b, ln2_w, ln2_b, time_decay, time_first
    w_kvr_ref,    # (1, 2D, 3D) time-mix-folded [Wk | Wv | Wr]
    w_ao_ref,     # (1, D, D)   attention output weight
    w_ffn_ref,    # (1, 2D, F+D) time-mix-folded [Wk_ffn | Wr_ffn]
    w_fv_ref,     # (1, F, D)   ffn value weight
    xout_ref,     # (B, T, D)   final activations (constant output block)
    states_ref,   # (1, B, 5, D) packed per-layer states
    x_scr,        # (B, T, D) f32 scratch: residual stream, persists across layers
):
    layer = pl.program_id(0)
    bsz, tsz, dim = x_scr.shape
    ffn_dim = w_fv_ref.shape[1]

    vecs = vecs_ref[0]                           # (8, D)
    ln1_w, ln1_b = vecs[2:3, :], vecs[3:4, :]
    ln2_w, ln2_b = vecs[4:5, :], vecs[5:6, :]
    w_dec = jnp.exp(vecs[6:7, :])                # w = exp(time_decay), EUP slot is free
    u = vecs[7:8, :]                             # time_first

    # First layer: apply pre-norm (ln0) and seed the resident residual stream.
    @pl.when(layer == 0)
    def _():
        x_scr[...] = _layernorm(x_ref[...], vecs[0:1, :], vecs[1:2, :])

    x = x_scr[...]

    # ---------------- attention: ln1 -> fused (K|V|R) matmul -> WKV -> O -> residual
    xln1 = _layernorm(x, ln1_w, ln1_b)
    last1 = _time_shift(xln1)
    mix1 = jnp.concatenate([xln1, last1], axis=-1).reshape(bsz * tsz, 2 * dim)
    kvr = jnp.dot(mix1, w_kvr_ref[0], preferred_element_type=jnp.float32)
    kvr = kvr.reshape(bsz, tsz, 3 * dim)
    k = kvr[:, :, :dim]                          # (B, T, D)
    v = kvr[:, :, dim:2 * dim]
    sr = jax.nn.sigmoid(kvr[:, :, 2 * dim:])

    # wkv_with_eps recurrence, fully in vregs, vectorized over batch (B, D) rows.
    # T is small & static -> fully unrolled (use lax.fori_loop(unroll=8) for large T).
    alpha = jnp.zeros((bsz, dim), jnp.float32)
    beta = jnp.zeros((bsz, dim), jnp.float32)
    eps = jnp.zeros((bsz, dim), jnp.float32)
    wkv_rows = []
    for t in range(tsz):
        kt = k[:, t, :]                          # (B, D)
        vt = v[:, t, :]
        ukt = u + kt
        tau = jnp.maximum(ukt, eps)
        e1 = jnp.exp(eps - tau)
        e2 = jnp.exp(ukt - tau)
        wkv_rows.append((e1 * alpha + e2 * vt) / (e1 * beta + e2))
        w_eps = eps - w_dec
        eps = jnp.maximum(w_eps, kt)
        e1 = jnp.exp(w_eps - eps)
        e2 = jnp.exp(kt - eps)
        alpha = e1 * alpha + e2 * vt
        beta = e1 * beta + e2
    wkv = jnp.stack(wkv_rows, axis=1)            # (B, T, D)

    rwkv = (wkv * sr).reshape(bsz * tsz, dim)
    att_out = jnp.dot(rwkv, w_ao_ref[0], preferred_element_type=jnp.float32)
    x = x + att_out.reshape(bsz, tsz, dim)

    # ---------------- feed-forward: ln2 -> fused (K|R) matmul -> relu(k)^2 @ Wv -> residual
    xln2 = _layernorm(x, ln2_w, ln2_b)
    last2 = _time_shift(xln2)
    mix2 = jnp.concatenate([xln2, last2], axis=-1).reshape(bsz * tsz, 2 * dim)
    krf = jnp.dot(mix2, w_ffn_ref[0], preferred_element_type=jnp.float32)   # (B*T, F+D)
    kf = jnp.maximum(krf[:, :ffn_dim], 0.0)
    rf = krf[:, ffn_dim:]
    vk = jnp.dot(kf * kf, w_fv_ref[0], preferred_element_type=jnp.float32)  # (B*T, D)
    ffn_out = jax.nn.sigmoid(rf) * vk

    x_new = x + ffn_out.reshape(bsz, tsz, dim)
    x_scr[...] = x_new                           # carry residual stream to next layer
    xout_ref[...] = x_new                        # final writeback happens once at grid end

    # single packed state store: [ln1(x)[-1], alpha, beta, eps, ln2(x)[-1]]
    states_ref[0] = jnp.concatenate(
        [xln1[:, tsz - 1:tsz, :],
         alpha.reshape(bsz, 1, dim),
         beta.reshape(bsz, 1, dim),
         eps.reshape(bsz, 1, dim),
         xln2[:, tsz - 1:tsz, :]],
        axis=1,
    )


# ----------------------------------------------------------------------------- wrapper
def _fold_mix(tm, w):
    # (x*tm + last*(1-tm)) @ W  ==  concat([x, last], -1) @ concat([tm*W, (1-tm)*W], 0)
    return jnp.concatenate([tm[:, None] * w, (1.0 - tm)[:, None] * w], axis=0)


def _stack_block_params(block_params):
    vecs, w_kvr, w_ao, w_ffn, w_fv = [], [], [], [], []
    for p in block_params:
        vecs.append(jnp.stack(
            [p["ln0_w"], p["ln0_b"], p["ln1_w"], p["ln1_b"],
             p["ln2_w"], p["ln2_b"], p["att_td"], p["att_tf"]], axis=0))      # (8, D)
        w_kvr.append(jnp.concatenate(
            [_fold_mix(p["att_tmk"], p["att_Wk"]),
             _fold_mix(p["att_tmv"], p["att_Wv"]),
             _fold_mix(p["att_tmr"], p["att_Wr"])], axis=1))                  # (2D, 3D)
        w_ao.append(p["att_Wo"])                                              # (D, D)
        w_ffn.append(jnp.concatenate(
            [_fold_mix(p["ffn_tmk"], p["ffn_Wk"]),
             _fold_mix(p["ffn_tmr"], p["ffn_Wr"])], axis=1))                  # (2D, F+D)
        w_fv.append(p["ffn_Wv"])                                              # (F, D)
    return (jnp.stack(vecs, 0), jnp.stack(w_kvr, 0), jnp.stack(w_ao, 0),
            jnp.stack(w_ffn, 0), jnp.stack(w_fv, 0))


def _rwkv_stack_pallas(x, vecs, w_kvr, w_ao, w_ffn, w_fv):
    bsz, tsz, dim = x.shape
    nlayers = vecs.shape[0]
    ffn_dim = w_fv.shape[1]

    return pl.pallas_call(
        rwkv_stack_kernel,
        grid=(nlayers,),
        out_shape=(
            jax.ShapeDtypeStruct((bsz, tsz, dim), jnp.float32),        # x_out
            jax.ShapeDtypeStruct((nlayers, bsz, 5, dim), jnp.float32), # packed per-layer states
        ),
        in_specs=[
            pl.BlockSpec((bsz, tsz, dim), lambda l: (0, 0, 0)),               # x (resident)
            pl.BlockSpec((1, 8, dim), lambda l: (l, 0, 0)),                   # vecs[l]
            pl.BlockSpec((1, 2 * dim, 3 * dim), lambda l: (l, 0, 0)),         # w_kvr[l]
            pl.BlockSpec((1, dim, dim), lambda l: (l, 0, 0)),                 # w_ao[l]
            pl.BlockSpec((1, 2 * dim, ffn_dim + dim), lambda l: (l, 0, 0)),   # w_ffn[l]
            pl.BlockSpec((1, ffn_dim, dim), lambda l: (l, 0, 0)),             # w_fv[l]
        ],
        out_specs=(
            pl.BlockSpec((bsz, tsz, dim), lambda l: (0, 0, 0)),               # x_out (resident)
            pl.BlockSpec((1, bsz, 5, dim), lambda l: (l, 0, 0, 0)),           # states[l]
        ),
        scratch_shapes=[pltpu.VMEM((bsz, tsz, dim), jnp.float32)],            # residual stream
        compiler_params=pltpu.CompilerParams(
            dimension_semantics=("arbitrary",)),                              # layers are sequential
    )(x, vecs, w_kvr, w_ao, w_ffn, w_fv)


@jax.jit
def _rwkv_stack_impl(x, block_params):
    vecs, w_kvr, w_ao, w_ffn, w_fv = _stack_block_params(block_params)
    return _rwkv_stack_pallas(x, vecs, w_kvr, w_ao, w_ffn, w_fv)


def rwkv_stack_forward(x, block_params):
    bsz, _, dim = x.shape
    x_out, states_all = _rwkv_stack_impl(x, block_params)
    states = []
    for i in range(len(block_params)):
        st = states_all[i]                                   # (B, 5, D)
        att_last = st[:, 0:1, :]
        wkv_state = st[:, 1:4, :].reshape(bsz, 3, 1, dim)
        ffn_last = st[:, 4:5, :]
        states.append(((att_last, wkv_state), ffn_last))
    return x_out, states


# ----------------------------------------------------------------------------- pure-JAX reference
def _mm(a, b):
    return jnp.dot(a, b, precision=jax.lax.Precision.HIGHEST)


def ref_layernorm(x, w, b):
    mu = jnp.mean(x, -1, keepdims=True)
    var = jnp.mean((x - mu) ** 2, -1, keepdims=True)
    return (x - mu) / jnp.sqrt(var + LN_EPS) * w + b


def ref_time_shift(x):
    bsz, _, dim = x.shape
    return jnp.concatenate([jnp.zeros((bsz, 1, dim), x.dtype), x[:, :-1, :]], axis=1)


def ref_wkv_with_eps(w, u, k, v):
    bsz, tsz, dim = k.shape
    alpha = jnp.zeros((bsz, 1, dim), jnp.float32)
    beta = jnp.zeros((bsz, 1, dim), jnp.float32)
    eps = jnp.zeros((bsz, 1, dim), jnp.float32)
    wkvs = []
    for t in range(tsz):
        kt, vt = k[:, t:t + 1], v[:, t:t + 1]
        ukt = u + kt
        tau = jnp.maximum(ukt, eps)
        e1, e2 = jnp.exp(eps - tau), jnp.exp(ukt - tau)
        wkvs.append((e1 * alpha + e2 * vt) / (e1 * beta + e2))
        w_eps = eps - w
        eps = jnp.maximum(w_eps, kt)
        e1, e2 = jnp.exp(w_eps - eps), jnp.exp(kt - eps)
        alpha = e1 * alpha + e2 * vt
        beta = e1 * beta + e2
    state = jnp.stack([alpha[:, 0], beta[:, 0], eps[:, 0]], axis=1)[:, :, None, :]
    return jnp.concatenate(wkvs, axis=1), state


def ref_block(x, p, pre_norm):
    if pre_norm:
        x = ref_layernorm(x, p["ln0_w"], p["ln0_b"])
    xln1 = ref_layernorm(x, p["ln1_w"], p["ln1_b"])
    last = ref_time_shift(xln1)
    tmk, tmv, tmr = p["att_tmk"], p["att_tmv"], p["att_tmr"]
    k = _mm(xln1 * tmk + last * (1 - tmk), p["att_Wk"])
    v = _mm(xln1 * tmv + last * (1 - tmv), p["att_Wv"])
    r = _mm(xln1 * tmr + last * (1 - tmr), p["att_Wr"])
    sr = jax.nn.sigmoid(r)
    wkv, wkv_state = ref_wkv_with_eps(jnp.exp(p["att_td"]), p["att_tf"], k, v)
    x = x + _mm(wkv * sr, p["att_Wo"])
    att_state = (xln1[:, -1:, :], wkv_state)

    xln2 = ref_layernorm(x, p["ln2_w"], p["ln2_b"])
    last2 = ref_time_shift(xln2)
    k2 = _mm(xln2 * p["ffn_tmk"] + last2 * (1 - p["ffn_tmk"]), p["ffn_Wk"])
    r2 = _mm(xln2 * p["ffn_tmr"] + last2 * (1 - p["ffn_tmr"]), p["ffn_Wr"])
    vk = _mm(jnp.maximum(k2, 0.0) ** 2, p["ffn_Wv"])
    x = x + jax.nn.sigmoid(r2) * vk
    return x, (att_state, xln2[:, -1:, :])


def ref_stack(x, block_params):
    states = []
    for i, p in enumerate(block_params):
        x, st = ref_block(x, p, pre_norm=(i == 0))
        states.append(st)
    return x, states


# ----------------------------------------------------------------------------- params
def init_block_params(key, dim, ffn_dim):
    keys = list(jax.random.split(key, 21))
    it = iter(keys)
    nrm = lambda shape, s: (s * jax.random.normal(next(it), shape)).astype(jnp.float32)
    uni = lambda shape: jax.random.uniform(next(it), shape, jnp.float32)
    return {
        "ln0_w": 1.0 + nrm((dim,), 0.1), "ln0_b": nrm((dim,), 0.1),
        "ln1_w": 1.0 + nrm((dim,), 0.1), "ln1_b": nrm((dim,), 0.1),
        "ln2_w": 1.0 + nrm((dim,), 0.1), "ln2_b": nrm((dim,), 0.1),
        "att_tmk": uni((dim,)), "att_tmv": uni((dim,)), "att_tmr": uni((dim,)),
        "att_td": nrm((dim,), 0.5), "att_tf": nrm((dim,), 0.5),
        # weights stored as (in, out) == torch Linear.weight.T
        "att_Wk": nrm((dim, dim), 1.0 / math.sqrt(dim)),
        "att_Wv": nrm((dim, dim), 1.0 / math.sqrt(dim)),
        "att_Wr": nrm((dim, dim), 1.0 / math.sqrt(dim)),
        "att_Wo": nrm((dim, dim), 1.0 / math.sqrt(dim)),
        "ffn_tmk": uni((dim,)), "ffn_tmr": uni((dim,)),
        "ffn_Wk": nrm((dim, ffn_dim), 1.0 / math.sqrt(dim)),
        "ffn_Wr": nrm((dim, dim), 1.0 / math.sqrt(dim)),
        "ffn_Wv": nrm((ffn_dim, dim), 1.0 / math.sqrt(ffn_dim)),
    }


# ----------------------------------------------------------------------------- main
if __name__ == "__main__":
    B, T, D = 2, 8, 32
    NUM_LAYERS, FF_FACTOR = 2, 4
    F = D * FF_FACTOR

    key = jax.random.PRNGKey(0)
    kx, kp = jax.random.split(key)
    x = jax.random.normal(kx, (B, T, D), jnp.float32)
    params = [init_block_params(k, D, F) for k in jax.random.split(kp, NUM_LAYERS)]

    out, states = rwkv_stack_forward(x, params)
    out = jax.block_until_ready(out)

    ref_out, ref_states = ref_stack(x, params)

    assert np.allclose(np.asarray(out), np.asarray(ref_out), rtol=1e-2, atol=1e-2), "x_out mismatch"
    for (att_st, ffn_st), (ratt_st, rffn_st) in zip(states, ref_states):
        assert np.allclose(np.asarray(att_st[0]), np.asarray(ratt_st[0]), rtol=1e-2, atol=1e-2)
        assert np.allclose(np.asarray(att_st[1]), np.asarray(ratt_st[1]), rtol=1e-2, atol=1e-2)
        assert np.allclose(np.asarray(ffn_st), np.asarray(rffn_st), rtol=1e-2, atol=1e-2)

    print("KERNEL_OK")
</pallas_src>

<mosaic_0001>
module attributes {stable_mosaic.version = 11 : i64} {
  func.func @rwkv_stack_kernel(%arg0: i32, %arg1: memref<2x8x32xf32, #tpu.memory_space<vmem>>, %arg2: memref<1x8x32xf32, #tpu.memory_space<vmem>>, %arg3: memref<1x64x96xf32, #tpu.memory_space<vmem>>, %arg4: memref<1x32x32xf32, #tpu.memory_space<vmem>>, %arg5: memref<1x64x160xf32, #tpu.memory_space<vmem>>, %arg6: memref<1x128x32xf32, #tpu.memory_space<vmem>>, %arg7: memref<2x8x32xf32, #tpu.memory_space<vmem>>, %arg8: memref<1x2x5x32xf32, #tpu.memory_space<vmem>>, %arg9: memref<2x8x32xf32, #tpu.memory_space<vmem>>) attributes {dimension_semantics = [#tpu.dimension_semantics<arbitrary>], iteration_bounds = array<i64: 2>, scalar_prefetch = 0 : i64, scratch_operands = 1 : i64, tpu.core_type = #tpu.core_type<tc>, window_params = [{pipeline_mode = #tpu.pipeline_mode<synchronous>, transform_indices = @transform_0, window_bounds = array<i64: 2, 8, 32>}, {transform_indices = @transform_1, window_bounds = array<i64: 1, 8, 32>}, {transform_indices = @transform_2, window_bounds = array<i64: 1, 64, 96>}, {transform_indices = @transform_3, window_bounds = array<i64: 1, 32, 32>}, {transform_indices = @transform_4, window_bounds = array<i64: 1, 64, 160>}, {transform_indices = @transform_5, window_bounds = array<i64: 1, 128, 32>}, {pipeline_mode = #tpu.pipeline_mode<synchronous>, transform_indices = @transform_6, window_bounds = array<i64: 2, 8, 32>}, {transform_indices = @transform_7, window_bounds = array<i64: 1, 2, 5, 32>}]} {
    %c0 = arith.constant 0 : index
    %c0_0 = arith.constant 0 : index
    %c0_1 = arith.constant 0 : index
    %0 = vector.load %arg2[%c0, %c0_0, %c0_1] : memref<1x8x32xf32, #tpu.memory_space<vmem>>, vector<1x8x32xf32>
    %1 = vector.shape_cast %0 : vector<1x8x32xf32> to vector<8x32xf32>
    %2 = vector.extract_strided_slice %1 {offsets = [2, 0], sizes = [1, 32], strides = [1, 1]} : vector<8x32xf32> to vector<1x32xf32>
    %3 = vector.extract_strided_slice %1 {offsets = [3, 0], sizes = [1, 32], strides = [1, 1]} : vector<8x32xf32> to vector<1x32xf32>
    %4 = vector.extract_strided_slice %1 {offsets = [4, 0], sizes = [1, 32], strides = [1, 1]} : vector<8x32xf32> to vector<1x32xf32>
    %5 = vector.extract_strided_slice %1 {offsets = [5, 0], sizes = [1, 32], strides = [1, 1]} : vector<8x32xf32> to vector<1x32xf32>
    %6 = vector.extract_strided_slice %1 {offsets = [6, 0], sizes = [1, 32], strides = [1, 1]} : vector<8x32xf32> to vector<1x32xf32>
    %7 = math.exp %6 : vector<1x32xf32>
    %8 = vector.extract_strided_slice %1 {offsets = [7, 0], sizes = [1, 32], strides = [1, 1]} : vector<8x32xf32> to vector<1x32xf32>
    %c0_i32 = arith.constant 0 : i32
    %9 = arith.cmpi eq, %arg0, %c0_i32 : i32
    %10 = arith.extui %9 : i1 to i32
    %c0_i32_2 = arith.constant 0 : i32
    %11 = arith.cmpi ne, %10, %c0_i32_2 : i32
    scf.if %11 {
      %c0_49 = arith.constant 0 : index
      %c0_50 = arith.constant 0 : index
      %c0_51 = arith.constant 0 : index
      %360 = vector.load %arg1[%c0_49, %c0_50, %c0_51] : memref<2x8x32xf32, #tpu.memory_space<vmem>>, vector<2x8x32xf32>
      %361 = vector.extract_strided_slice %1 {offsets = [0, 0], sizes = [1, 32], strides = [1, 1]} : vector<8x32xf32> to vector<1x32xf32>
      %362 = vector.extract_strided_slice %1 {offsets = [1, 0], sizes = [1, 32], strides = [1, 1]} : vector<8x32xf32> to vector<1x32xf32>
      %cst_52 = arith.constant dense<0.000000e+00> : vector<2x8xf32>
      %363 = vector.multi_reduction <add>, %360, %cst_52 [2] : vector<2x8x32xf32> to vector<2x8xf32>
      %364 = vector.shape_cast %363 : vector<2x8xf32> to vector<2x8x1xf32>
      %cst_53 = arith.constant 3.200000e+01 : f32
      %365 = vector.broadcast %cst_53 : f32 to vector<2x8x1xf32>
      %366 = arith.divf %364, %365 : vector<2x8x1xf32>
      %367 = vector.broadcast %366 : vector<2x8x1xf32> to vector<2x8x32xf32>
      %368 = arith.subf %360, %367 : vector<2x8x32xf32>
      %369 = arith.mulf %368, %368 : vector<2x8x32xf32>
      %cst_54 = arith.constant dense<0.000000e+00> : vector<2x8xf32>
      %370 = vector.multi_reduction <add>, %369, %cst_54 [2] : vector<2x8x32xf32> to vector<2x8xf32>
      %371 = vector.shape_cast %370 : vector<2x8xf32> to vector<2x8x1xf32>
      %cst_55 = arith.constant 3.200000e+01 : f32
      %372 = vector.broadcast %cst_55 : f32 to vector<2x8x1xf32>
      %373 = arith.divf %371, %372 : vector<2x8x1xf32>
      %cst_56 = arith.constant 9.99999974E-6 : f32
      %374 = vector.broadcast %cst_56 : f32 to vector<2x8x1xf32>
      %375 = arith.addf %373, %374 : vector<2x8x1xf32>
      %376 = math.rsqrt %375 : vector<2x8x1xf32>
      %377 = vector.broadcast %376 : vector<2x8x1xf32> to vector<2x8x32xf32>
      %378 = arith.mulf %368, %377 : vector<2x8x32xf32>
      %379 = vector.shape_cast %361 : vector<1x32xf32> to vector<1x1x32xf32>
      %380 = vector.broadcast %379 : vector<1x1x32xf32> to vector<2x8x32xf32>
      %381 = arith.mulf %378, %380 : vector<2x8x32xf32>
      %382 = vector.shape_cast %362 : vector<1x32xf32> to vector<1x1x32xf32>
      %383 = vector.broadcast %382 : vector<1x1x32xf32> to vector<2x8x32xf32>
      %384 = arith.addf %381, %383 : vector<2x8x32xf32>
      %c0_57 = arith.constant 0 : index
      %c0_58 = arith.constant 0 : index
      %c0_59 = arith.constant 0 : index
      %385 = vector.load %arg9[%c0_57, %c0_58, %c0_59] : memref<2x8x32xf32, #tpu.memory_space<vmem>>, vector<2x8x32xf32>
      tpu.vector_store %arg9[%c0_57, %c0_58, %c0_59], %384 {strides = array<i32>} : memref<2x8x32xf32, #tpu.memory_space<vmem>>, vector<2x8x32xf32>,
    } else {
    }
    %c0_3 = arith.constant 0 : index
    %c0_4 = arith.constant 0 : index
    %c0_5 = arith.constant 0 : index
    %12 = vector.load %arg9[%c0_3, %c0_4, %c0_5] : memref<2x8x32xf32, #tpu.memory_space<vmem>>, vector<2x8x32xf32>
    %cst = arith.constant dense<0.000000e+00> : vector<2x8xf32>
    %13 = vector.multi_reduction <add>, %12, %cst [2] : vector<2x8x32xf32> to vector<2x8xf32>
    %14 = vector.shape_cast %13 : vector<2x8xf32> to vector<2x8x1xf32>
    %cst_6 = arith.constant 3.200000e+01 : f32
    %15 = vector.broadcast %cst_6 : f32 to vector<2x8x1xf32>
    %16 = arith.divf %14, %15 : vector<2x8x1xf32>
    %17 = vector.broadcast %16 : vector<2x8x1xf32> to vector<2x8x32xf32>
    %18 = arith.subf %12, %17 : vector<2x8x32xf32>
    %19 = arith.mulf %18, %18 : vector<2x8x32xf32>
    %cst_7 = arith.constant dense<0.000000e+00> : vector<2x8xf32>
    %20 = vector.multi_reduction <add>, %19, %cst_7 [2] : vector<2x8x32xf32> to vector<2x8xf32>
    %21 = vector.shape_cast %20 : vector<2x8xf32> to vector<2x8x1xf32>
    %cst_8 = arith.constant 3.200000e+01 : f32
    %22 = vector.broadcast %cst_8 : f32 to vector<2x8x1xf32>
    %23 = arith.divf %21, %22 : vector<2x8x1xf32>
    %cst_9 = arith.constant 9.99999974E-6 : f32
    %24 = vector.broadcast %cst_9 : f32 to vector<2x8x1xf32>
    %25 = arith.addf %23, %24 : vector<2x8x1xf32>
    %26 = math.rsqrt %25 : vector<2x8x1xf32>
    %27 = vector.broadcast %26 : vector<2x8x1xf32> to vector<2x8x32xf32>
    %28 = arith.mulf %18, %27 : vector<2x8x32xf32>
    %29 = vector.shape_cast %2 : vector<1x32xf32> to vector<1x1x32xf32>
    %30 = vector.broadcast %29 : vector<1x1x32xf32> to vector<2x8x32xf32>
    %31 = arith.mulf %28, %30 : vector<2x8x32xf32>
    %32 = vector.shape_cast %3 : vector<1x32xf32> to vector<1x1x32xf32>
    %33 = vector.broadcast %32 : vector<1x1x32xf32> to vector<2x8x32xf32>
    %34 = arith.addf %31, %33 : vector<2x8x32xf32>
    %cst_10 = arith.constant 0.000000e+00 : f32
    %35 = vector.broadcast %cst_10 : f32 to vector<2x1x32xf32>
    %36 = vector.extract_strided_slice %34 {offsets = [0, 0, 0], sizes = [2, 7, 32], strides = [1, 1, 1]} : vector<2x8x32xf32> to vector<2x7x32xf32>
    %37 = tpu.concatenate %35, %36 in 1 : vector<2x1x32xf32>, vector<2x7x32xf32> -> vector<2x8x32xf32>
    %38 = tpu.concatenate %34, %37 in 2 : vector<2x8x32xf32>, vector<2x8x32xf32> -> vector<2x8x64xf32>
    %39 = vector.shape_cast %38 : vector<2x8x64xf32> to vector<16x64xf32>
    %c0_11 = arith.constant 0 : index
    %c0_12 = arith.constant 0 : index
    %c0_13 = arith.constant 0 : index
    %40 = vector.load %arg3[%c0_11, %c0_12, %c0_13] : memref<1x64x96xf32, #tpu.memory_space<vmem>>, vector<1x64x96xf32>
    %41 = vector.shape_cast %40 : vector<1x64x96xf32> to vector<64x96xf32>
    %cst_14 = arith.constant dense<0.000000e+00> : vector<16x96xf32>
    %42 = tpu.matmul %39, %41, %cst_14 {dimension_numbers = #tpu.dot_dimension_numbers<[1], [0], [0], [1], [0, 0, 1, 1], [], []>} : vector<16x64xf32>, vector<64x96xf32>, vector<16x96xf32> -> vector<16x96xf32>
    %43 = vector.shape_cast %42 : vector<16x96xf32> to vector<2x8x96xf32>
    %44 = vector.extract_strided_slice %43 {offsets = [0, 0, 0], sizes = [2, 8, 32], strides = [1, 1, 1]} : vector<2x8x96xf32> to vector<2x8x32xf32>
    %45 = vector.extract_strided_slice %43 {offsets = [0, 0, 32], sizes = [2, 8, 32], strides = [1, 1, 1]} : vector<2x8x96xf32> to vector<2x8x32xf32>
    %46 = vector.extract_strided_slice %43 {offsets = [0, 0, 64], sizes = [2, 8, 32], strides = [1, 1, 1]} : vector<2x8x96xf32> to vector<2x8x32xf32>
    %47 = arith.negf %46 : vector<2x8x32xf32>
    %48 = math.exp %47 : vector<2x8x32xf32>
    %cst_15 = arith.constant 1.000000e+00 : f32
    %49 = vector.broadcast %cst_15 : f32 to vector<2x8x32xf32>
    %50 = arith.addf %49, %48 : vector<2x8x32xf32>
    %51 = arith.divf %49, %50 : vector<2x8x32xf32>
    %cst_16 = arith.constant 0.000000e+00 : f32
    %52 = vector.broadcast %cst_16 : f32 to vector<2x32xf32>
    %cst_17 = arith.constant 0.000000e+00 : f32
    %53 = vector.broadcast %cst_17 : f32 to vector<2x32xf32>
    %cst_18 = arith.constant 0.000000e+00 : f32
    %54 = vector.broadcast %cst_18 : f32 to vector<2x32xf32>
    %55 = vector.extract_strided_slice %44 {offsets = [0, 0, 0], sizes = [2, 1, 32], strides = [1, 1, 1]} : vector<2x8x32xf32> to vector<2x1x32xf32>
    %56 = vector.shape_cast %55 : vector<2x1x32xf32> to vector<2x32xf32>
    %57 = vector.extract_strided_slice %45 {offsets = [0, 0, 0], sizes = [2, 1, 32], strides = [1, 1, 1]} : vector<2x8x32xf32> to vector<2x1x32xf32>
    %58 = vector.shape_cast %57 : vector<2x1x32xf32> to vector<2x32xf32>
    %59 = vector.broadcast %8 : vector<1x32xf32> to vector<2x32xf32>
    %60 = arith.addf %59, %56 : vector<2x32xf32>
    %61 = arith.maximumf %60, %54 : vector<2x32xf32>
    %62 = arith.subf %54, %61 : vector<2x32xf32>
    %63 = math.exp %62 : vector<2x32xf32>
    %64 = arith.subf %60, %61 : vector<2x32xf32>
    %65 = math.exp %64 : vector<2x32xf32>
    %66 = arith.mulf %63, %52 : vector<2x32xf32>
    %67 = arith.mulf %65, %58 : vector<2x32xf32>
    %68 = arith.addf %66, %67 : vector<2x32xf32>
    %69 = arith.mulf %63, %53 : vector<2x32xf32>
    %70 = arith.addf %69, %65 : vector<2x32xf32>
    %71 = arith.divf %68, %70 : vector<2x32xf32>
    %72 = vector.broadcast %7 : vector<1x32xf32> to vector<2x32xf32>
    %73 = arith.subf %54, %72 : vector<2x32xf32>
    %74 = arith.maximumf %73, %56 : vector<2x32xf32>
    %75 = arith.subf %73, %74 : vector<2x32xf32>
    %76 = math.exp %75 : vector<2x32xf32>
    %77 = arith.subf %56, %74 : vector<2x32xf32>
    %78 = math.exp %77 : vector<2x32xf32>
    %79 = arith.mulf %76, %52 : vector<2x32xf32>
    %80 = arith.mulf %78, %58 : vector<2x32xf32>
    %81 = arith.addf %79, %80 : vector<2x32xf32>
    %82 = arith.mulf %76, %53 : vector<2x32xf32>
    %83 = arith.addf %82, %78 : vector<2x32xf32>
    %84 = vector.extract_strided_slice %44 {offsets = [0, 1, 0], sizes = [2, 1, 32], strides = [1, 1, 1]} : vector<2x8x32xf32> to vector<2x1x32xf32>
    %85 = vector.shape_cast %84 : vector<2x1x32xf32> to vector<2x32xf32>
    %86 = vector.extract_strided_slice %45 {offsets = [0, 1, 0], sizes = [2, 1, 32], strides = [1, 1, 1]} : vector<2x8x32xf32> to vector<2x1x32xf32>
    %87 = vector.shape_cast %86 : vector<2x1x32xf32> to vector<2x32xf32>
    %88 = vector.broadcast %8 : vector<1x32xf32> to vector<2x32xf32>
    %89 = arith.addf %88, %85 : vector<2x32xf32>
    %90 = arith.maximumf %89, %74 : vector<2x32xf32>
    %91 = arith.subf %74, %90 : vector<2x32xf32>
    %92 = math.exp %91 : vector<2x32xf32>
    %93 = arith.subf %89, %90 : vector<2x32xf32>
    %94 = math.exp %93 : vector<2x32xf32>
    %95 = arith.mulf %92, %81 : vector<2x32xf32>
    %96 = arith.mulf %94, %87 : vector<2x32xf32>
    %97 = arith.addf %95, %96 : vector<2x32xf32>
    %98 = arith.mulf %92, %83 : vector<2x32xf32>
    %99 = arith.addf %98, %94 : vector<2x32xf32>
    %100 = arith.divf %97, %99 : vector<2x32xf32>
    %101 = vector.broadcast %7 : vector<1x32xf32> to vector<2x32xf32>
    %102 = arith.subf %74, %101 : vector<2x32xf32>
    %103 = arith.maximumf %102, %85 : vector<2x32xf32>
    %104 = arith.subf %102, %103 : vector<2x32xf32>
    %105 = math.exp %104 : vector<2x32xf32>
    %106 = arith.subf %85, %103 : vector<2x32xf32>
    %107 = math.exp %106 : vector<2x32xf32>
    %108 = arith.mulf %105, %81 : vector<2x32xf32>
    %109 = arith.mulf %107, %87 : vector<2x32xf32>
    %110 = arith.addf %108, %109 : vector<2x32xf32>
    %111 = arith.mulf %105, %83 : vector<2x32xf32>
    %112 = arith.addf %111, %107 : vector<2x32xf32>
    %113 = vector.extract_strided_slice %44 {offsets = [0, 2, 0], sizes = [2, 1, 32], strides = [1, 1, 1]} : vector<2x8x32xf32> to vector<2x1x32xf32>
    %114 = vector.shape_cast %113 : vector<2x1x32xf32> to vector<2x32xf32>
    %115 = vector.extract_strided_slice %45 {offsets = [0, 2, 0], sizes = [2, 1, 32], strides = [1, 1, 1]} : vector<2x8x32xf32> to vector<2x1x32xf32>
    %116 = vector.shape_cast %115 : vector<2x1x32xf32> to vector<2x32xf32>
    %117 = vector.broadcast %8 : vector<1x32xf32> to vector<2x32xf32>
    %118 = arith.addf %117, %114 : vector<2x32xf32>
    %119 = arith.maximumf %118, %103 : vector<2x32xf32>
    %120 = arith.subf %103, %119 : vector<2x32xf32>
    %121 = math.exp %120 : vector<2x32xf32>
    %122 = arith.subf %118, %119 : vector<2x32xf32>
    %123 = math.exp %122 : vector<2x32xf32>
    %124 = arith.mulf %121, %110 : vector<2x32xf32>
    %125 = arith.mulf %123, %116 : vector<2x32xf32>
    %126 = arith.addf %124, %125 : vector<2x32xf32>
    %127 = arith.mulf %121, %112 : vector<2x32xf32>
    %128 = arith.addf %127, %123 : vector<2x32xf32>
    %129 = arith.divf %126, %128 : vector<2x32xf32>
    %130 = vector.broadcast %7 : vector<1x32xf32> to vector<2x32xf32>
    %131 = arith.subf %103, %130 : vector<2x32xf32>
    %132 = arith.maximumf %131, %114 : vector<2x32xf32>
    %133 = arith.subf %131, %132 : vector<2x32xf32>
    %134 = math.exp %133 : vector<2x32xf32>
    %135 = arith.subf %114, %132 : vector<2x32xf32>
    %136 = math.exp %135 : vector<2x32xf32>
    %137 = arith.mulf %134, %110 : vector<2x32xf32>
    %138 = arith.mulf %136, %116 : vector<2x32xf32>
    %139 = arith.addf %137, %138 : vector<2x32xf32>
    %140 = arith.mulf %134, %112 : vector<2x32xf32>
    %141 = arith.addf %140, %136 : vector<2x32xf32>
    %142 = vector.extract_strided_slice %44 {offsets = [0, 3, 0], sizes = [2, 1, 32], strides = [1, 1, 1]} : vector<2x8x32xf32> to vector<2x1x32xf32>
    %143 = vector.shape_cast %142 : vector<2x1x32xf32> to vector<2x32xf32>
    %144 = vector.extract_strided_slice %45 {offsets = [0, 3, 0], sizes = [2, 1, 32], strides = [1, 1, 1]} : vector<2x8x32xf32> to vector<2x1x32xf32>
    %145 = vector.shape_cast %144 : vector<2x1x32xf32> to vector<2x32xf32>
    %146 = vector.broadcast %8 : vector<1x32xf32> to vector<2x32xf32>
    %147 = arith.addf %146, %143 : vector<2x32xf32>
    %148 = arith.maximumf %147, %132 : vector<2x32xf32>
    %149 = arith.subf %132, %148 : vector<2x32xf32>
    %150 = math.exp %149 : vector<2x32xf32>
    %151 = arith.subf %147, %148 : vector<2x32xf32>
    %152 = math.exp %151 : vector<2x32xf32>
    %153 = arith.mulf %150, %139 : vector<2x32xf32>
    %154 = arith.mulf %152, %145 : vector<2x32xf32>
    %155 = arith.addf %153, %154 : vector<2x32xf32>
    %156 = arith.mulf %150, %141 : vector<2x32xf32>
    %157 = arith.addf %156, %152 : vector<2x32xf32>
    %158 = arith.divf %155, %157 : vector<2x32xf32>
    %159 = vector.broadcast %7 : vector<1x32xf32> to vector<2x32xf32>
    %160 = arith.subf %132, %159 : vector<2x32xf32>
    %161 = arith.maximumf %160, %143 : vector<2x32xf32>
    %162 = arith.subf %160, %161 : vector<2x32xf32>
    %163 = math.exp %162 : vector<2x32xf32>
    %164 = arith.subf %143, %161 : vector<2x32xf32>
    %165 = math.exp %164 : vector<2x32xf32>
    %166 = arith.mulf %163, %139 : vector<2x32xf32>
    %167 = arith.mulf %165, %145 : vector<2x32xf32>
    %168 = arith.addf %166, %167 : vector<2x32xf32>
    %169 = arith.mulf %163, %141 : vector<2x32xf32>
    %170 = arith.addf %169, %165 : vector<2x32xf32>
    %171 = vector.extract_strided_slice %44 {offsets = [0, 4, 0], sizes = [2, 1, 32], strides = [1, 1, 1]} : vector<2x8x32xf32> to vector<2x1x32xf32>
    %172 = vector.shape_cast %171 : vector<2x1x32xf32> to vector<2x32xf32>
    %173 = vector.extract_strided_slice %45 {offsets = [0, 4, 0], sizes = [2, 1, 32], strides = [1, 1, 1]} : vector<2x8x32xf32> to vector<2x1x32xf32>
    %174 = vector.shape_cast %173 : vector<2x1x32xf32> to vector<2x32xf32>
    %175 = vector.broadcast %8 : vector<1x32xf32> to vector<2x32xf32>
    %176 = arith.addf %175, %172 : vector<2x32xf32>
    %177 = arith.maximumf %176, %161 : vector<2x32xf32>
    %178 = arith.subf %161, %177 : vector<2x32xf32>
    %179 = math.exp %178 : vector<2x32xf32>
    %180 = arith.subf %176, %177 : vector<2x32xf32>
    %181 = math.exp %180 : vector<2x32xf32>
    %182 = arith.mulf %179, %168 : vector<2x32xf32>
    %183 = arith.mulf %181, %174 : vector<2x32xf32>
    %184 = arith.addf %182, %183 : vector<2x32xf32>
    %185 = arith.mulf %179, %170 : vector<2x32xf32>
    %186 = arith.addf %185, %181 : vector<2x32xf32>
    %187 = arith.divf %184, %186 : vector<2x32xf32>
    %188 = vector.broadcast %7 : vector<1x32xf32> to vector<2x32xf32>
    %189 = arith.subf %161, %188 : vector<2x32xf32>
    %190 = arith.maximumf %189, %172 : vector<2x32xf32>
    %191 = arith.subf %189, %190 : vector<2x32xf32>
    %192 = math.exp %191 : vector<2x32xf32>
    %193 = arith.subf %172, %190 : vector<2x32xf32>
    %194 = math.exp %193 : vector<2x32xf32>
    %195 = arith.mulf %192, %168 : vector<2x32xf32>
    %196 = arith.mulf %194, %174 : vector<2x32xf32>
    %197 = arith.addf %195, %196 : vector<2x32xf32>
    %198 = arith.mulf %192, %170 : vector<2x32xf32>
    %199 = arith.addf %198, %194 : vector<2x32xf32>
    %200 = vector.extract_strided_slice %44 {offsets = [0, 5, 0], sizes = [2, 1, 32], strides = [1, 1, 1]} : vector<2x8x32xf32> to vector<2x1x32xf32>
    %201 = vector.shape_cast %200 : vector<2x1x32xf32> to vector<2x32xf32>
    %202 = vector.extract_strided_slice %45 {offsets = [0, 5, 0], sizes = [2, 1, 32], strides = [1, 1, 1]} : vector<2x8x32xf32> to vector<2x1x32xf32>
    %203 = vector.shape_cast %202 : vector<2x1x32xf32> to vector<2x32xf32>
    %204 = vector.broadcast %8 : vector<1x32xf32> to vector<2x32xf32>
    %205 = arith.addf %204, %201 : vector<2x32xf32>
    %206 = arith.maximumf %205, %190 : vector<2x32xf32>
    %207 = arith.subf %190, %206 : vector<2x32xf32>
    %208 = math.exp %207 : vector<2x32xf32>
    %209 = arith.subf %205, %206 : vector<2x32xf32>
    %210 = math.exp %209 : vector<2x32xf32>
    %211 = arith.mulf %208, %197 : vector<2x32xf32>
    %212 = arith.mulf %210, %203 : vector<2x32xf32>
    %213 = arith.addf %211, %212 : vector<2x32xf32>
    %214 = arith.mulf %208, %199 : vector<2x32xf32>
    %215 = arith.addf %214, %210 : vector<2x32xf32>
    %216 = arith.divf %213, %215 : vector<2x32xf32>
    %217 = vector.broadcast %7 : vector<1x32xf32> to vector<2x32xf32>
    %218 = arith.subf %190, %217 : vector<2x32xf32>
    %219 = arith.maximumf %218, %201 : vector<2x32xf32>
    %220 = arith.subf %218, %219 : vector<2x32xf32>
    %221 = math.exp %220 : vector<2x32xf32>
    %222 = arith.subf %201, %219 : vector<2x32xf32>
    %223 = math.exp %222 : vector<2x32xf32>
    %224 = arith.mulf %221, %197 : vector<2x32xf32>
    %225 = arith.mulf %223, %203 : vector<2x32xf32>
    %226 = arith.addf %224, %225 : vector<2x32xf32>
    %227 = arith.mulf %221, %199 : vector<2x32xf32>
    %228 = arith.addf %227, %223 : vector<2x32xf32>
    %229 = vector.extract_strided_slice %44 {offsets = [0, 6, 0], sizes = [2, 1, 32], strides = [1, 1, 1]} : vector<2x8x32xf32> to vector<2x1x32xf32>
    %230 = vector.shape_cast %229 : vector<2x1x32xf32> to vector<2x32xf32>
    %231 = vector.extract_strided_slice %45 {offsets = [0, 6, 0], sizes = [2, 1, 32], strides = [1, 1, 1]} : vector<2x8x32xf32> to vector<2x1x32xf32>
    %232 = vector.shape_cast %231 : vector<2x1x32xf32> to vector<2x32xf32>
    %233 = vector.broadcast %8 : vector<1x32xf32> to vector<2x32xf32>
    %234 = arith.addf %233, %230 : vector<2x32xf32>
    %235 = arith.maximumf %234, %219 : vector<2x32xf32>
    %236 = arith.subf %219, %235 : vector<2x32xf32>
    %237 = math.exp %236 : vector<2x32xf32>
    %238 = arith.subf %234, %235 : vector<2x32xf32>
    %239 = math.exp %238 : vector<2x32xf32>
    %240 = arith.mulf %237, %226 : vector<2x32xf32>
    %241 = arith.mulf %239, %232 : vector<2x32xf32>
    %242 = arith.addf %240, %241 : vector<2x32xf32>
    %243 = arith.mulf %237, %228 : vector<2x32xf32>
    %244 = arith.addf %243, %239 : vector<2x32xf32>
    %245 = arith.divf %242, %244 : vector<2x32xf32>
    %246 = vector.broadcast %7 : vector<1x32xf32> to vector<2x32xf32>
    %247 = arith.subf %219, %246 : vector<2x32xf32>
    %248 = arith.maximumf %247, %230 : vector<2x32xf32>
    %249 = arith.subf %247, %248 : vector<2x32xf32>
    %250 = math.exp %249 : vector<2x32xf32>
    %251 = arith.subf %230, %248 : vector<2x32xf32>
    %252 = math.exp %251 : vector<2x32xf32>
    %253 = arith.mulf %250, %226 : vector<2x32xf32>
    %254 = arith.mulf %252, %232 : vector<2x32xf32>
    %255 = arith.addf %253, %254 : vector<2x32xf32>
    %256 = arith.mulf %250, %228 : vector<2x32xf32>
    %257 = arith.addf %256, %252 : vector<2x32xf32>
    %258 = vector.extract_strided_slice %44 {offsets = [0, 7, 0], sizes = [2, 1, 32], strides = [1, 1, 1]} : vector<2x8x32xf32> to vector<2x1x32xf32>
    %259 = vector.shape_cast %258 : vector<2x1x32xf32> to vector<2x32xf32>
    %260 = vector.extract_strided_slice %45 {offsets = [0, 7, 0], sizes = [2, 1, 32], strides = [1, 1, 1]} : vector<2x8x32xf32> to vector<2x1x32xf32>
    %261 = vector.shape_cast %260 : vector<2x1x32xf32> to vector<2x32xf32>
    %262 = vector.broadcast %8 : vector<1x32xf32> to vector<2x32xf32>
    %263 = arith.addf %262, %259 : vector<2x32xf32>
    %264 = arith.maximumf %263, %248 : vector<2x32xf32>
    %265 = arith.subf %248, %264 : vector<2x32xf32>
    %266 = math.exp %265 : vector<2x32xf32>
    %267 = arith.subf %263, %264 : vector<2x32xf32>
    %268 = math.exp %267 : vector<2x32xf32>
    %269 = arith.mulf %266, %255 : vector<2x32xf32>
    %270 = arith.mulf %268, %261 : vector<2x32xf32>
    %271 = arith.addf %269, %270 : vector<2x32xf32>
    %272 = arith.mulf %266, %257 : vector<2x32xf32>
    %273 = arith.addf %272, %268 : vector<2x32xf32>
    %274 = arith.divf %271, %273 : vector<2x32xf32>
    %275 = vector.broadcast %7 : vector<1x32xf32> to vector<2x32xf32>
    %276 = arith.subf %248, %275 : vector<2x32xf32>
    %277 = arith.maximumf %276, %259 : vector<2x32xf32>
    %278 = arith.subf %276, %277 : vector<2x32xf32>
    %279 = math.exp %278 : vector<2x32xf32>
    %280 = arith.subf %259, %277 : vector<2x32xf32>
    %281 = math.exp %280 : vector<2x32xf32>
    %282 = arith.mulf %279, %255 : vector<2x32xf32>
    %283 = arith.mulf %281, %261 : vector<2x32xf32>
    %284 = arith.addf %282, %283 : vector<2x32xf32>
    %285 = arith.mulf %279, %257 : vector<2x32xf32>
    %286 = arith.addf %285, %281 : vector<2x32xf32>
    %287 = vector.shape_cast %71 : vector<2x32xf32> to vector<2x1x32xf32>
    %288 = vector.shape_cast %100 : vector<2x32xf32> to vector<2x1x32xf32>
    %289 = vector.shape_cast %129 : vector<2x32xf32> to vector<2x1x32xf32>
    %290 = vector.shape_cast %158 : vector<2x32xf32> to vector<2x1x32xf32>
    %291 = vector.shape_cast %187 : vector<2x32xf32> to vector<2x1x32xf32>
    %292 = vector.shape_cast %216 : vector<2x32xf32> to vector<2x1x32xf32>
    %293 = vector.shape_cast %245 : vector<2x32xf32> to vector<2x1x32xf32>
    %294 = vector.shape_cast %274 : vector<2x32xf32> to vector<2x1x32xf32>
    %295 = tpu.concatenate %287, %288, %289, %290, %291, %292, %293, %294 in 1 : vector<2x1x32xf32>, vector<2x1x32xf32>, vector<2x1x32xf32>, vector<2x1x32xf32>, vector<2x1x32xf32>, vector<2x1x32xf32>, vector<2x1x32xf32>, vector<2x1x32xf32> -> vector<2x8x32xf32>
    %296 = arith.mulf %295, %51 : vector<2x8x32xf32>
    %297 = vector.shape_cast %296 : vector<2x8x32xf32> to vector<16x32xf32>
    %c0_19 = arith.constant 0 : index
    %c0_20 = arith.constant 0 : index
    %c0_21 = arith.constant 0 : index
    %298 = vector.load %arg4[%c0_19, %c0_20, %c0_21] : memref<1x32x32xf32, #tpu.memory_space<vmem>>, vector<1x32x32xf32>
    %299 = vector.shape_cast %298 : vector<1x32x32xf32> to vector<32x32xf32>
    %cst_22 = arith.constant dense<0.000000e+00> : vector<16x32xf32>
    %300 = tpu.matmul %297, %299, %cst_22 {dimension_numbers = #tpu.dot_dimension_numbers<[1], [0], [0], [1], [0, 0, 1, 1], [], []>} : vector<16x32xf32>, vector<32x32xf32>, vector<16x32xf32> -> vector<16x32xf32>
    %301 = vector.shape_cast %300 : vector<16x32xf32> to vector<2x8x32xf32>
    %302 = arith.addf %12, %301 : vector<2x8x32xf32>
    %cst_23 = arith.constant dense<0.000000e+00> : vector<2x8xf32>
    %303 = vector.multi_reduction <add>, %302, %cst_23 [2] : vector<2x8x32xf32> to vector<2x8xf32>
    %304 = vector.shape_cast %303 : vector<2x8xf32> to vector<2x8x1xf32>
    %cst_24 = arith.constant 3.200000e+01 : f32
    %305 = vector.broadcast %cst_24 : f32 to vector<2x8x1xf32>
    %306 = arith.divf %304, %305 : vector<2x8x1xf32>
    %307 = vector.broadcast %306 : vector<2x8x1xf32> to vector<2x8x32xf32>
    %308 = arith.subf %302, %307 : vector<2x8x32xf32>
    %309 = arith.mulf %308, %308 : vector<2x8x32xf32>
    %cst_25 = arith.constant dense<0.000000e+00> : vector<2x8xf32>
    %310 = vector.multi_reduction <add>, %309, %cst_25 [2] : vector<2x8x32xf32> to vector<2x8xf32>
    %311 = vector.shape_cast %310 : vector<2x8xf32> to vector<2x8x1xf32>
    %cst_26 = arith.constant 3.200000e+01 : f32
    %312 = vector.broadcast %cst_26 : f32 to vector<2x8x1xf32>
    %313 = arith.divf %311, %312 : vector<2x8x1xf32>
    %cst_27 = arith.constant 9.99999974E-6 : f32
    %314 = vector.broadcast %cst_27 : f32 to vector<2x8x1xf32>
    %315 = arith.addf %313, %314 : vector<2x8x1xf32>
    %316 = math.rsqrt %315 : vector<2x8x1xf32>
    %317 = vector.broadcast %316 : vector<2x8x1xf32> to vector<2x8x32xf32>
    %318 = arith.mulf %308, %317 : vector<2x8x32xf32>
    %319 = vector.shape_cast %4 : vector<1x32xf32> to vector<1x1x32xf32>
    %320 = vector.broadcast %319 : vector<1x1x32xf32> to vector<2x8x32xf32>
    %321 = arith.mulf %318, %320 : vector<2x8x32xf32>
    %322 = vector.shape_cast %5 : vector<1x32xf32> to vector<1x1x32xf32>
    %323 = vector.broadcast %322 : vector<1x1x32xf32> to vector<2x8x32xf32>
    %324 = arith.addf %321, %323 : vector<2x8x32xf32>
    %cst_28 = arith.constant 0.000000e+00 : f32
    %325 = vector.broadcast %cst_28 : f32 to vector<2x1x32xf32>
    %326 = vector.extract_strided_slice %324 {offsets = [0, 0, 0], sizes = [2, 7, 32], strides = [1, 1, 1]} : vector<2x8x32xf32> to vector<2x7x32xf32>
    %327 = tpu.concatenate %325, %326 in 1 : vector<2x1x32xf32>, vector<2x7x32xf32> -> vector<2x8x32xf32>
    %328 = tpu.concatenate %324, %327 in 2 : vector<2x8x32xf32>, vector<2x8x32xf32> -> vector<2x8x64xf32>
    %329 = vector.shape_cast %328 : vector<2x8x64xf32> to vector<16x64xf32>
    %c0_29 = arith.constant 0 : index
    %c0_30 = arith.constant 0 : index
    %c0_31 = arith.constant 0 : index
    %330 = vector.load %arg5[%c0_29, %c0_30, %c0_31] : memref<1x64x160xf32, #tpu.memory_space<vmem>>, vector<1x64x160xf32>
    %331 = vector.shape_cast %330 : vector<1x64x160xf32> to vector<64x160xf32>
    %cst_32 = arith.constant dense<0.000000e+00> : vector<16x160xf32>
    %332 = tpu.matmul %329, %331, %cst_32 {dimension_numbers = #tpu.dot_dimension_numbers<[1], [0], [0], [1], [0, 0, 1, 1], [], []>} : vector<16x64xf32>, vector<64x160xf32>, vector<16x160xf32> -> vector<16x160xf32>
    %333 = vector.extract_strided_slice %332 {offsets = [0, 0], sizes = [16, 128], strides = [1, 1]} : vector<16x160xf32> to vector<16x128xf32>
    %cst_33 = arith.constant 0.000000e+00 : f32
    %334 = vector.broadcast %cst_33 : f32 to vector<16x128xf32>
    %335 = arith.maximumf %333, %334 : vector<16x128xf32>
    %336 = vector.extract_strided_slice %332 {offsets = [0, 128], sizes = [16, 32], strides = [1, 1]} : vector<16x160xf32> to vector<16x32xf32>
    %337 = arith.mulf %335, %335 : vector<16x128xf32>
    %c0_34 = arith.constant 0 : index
    %c0_35 = arith.constant 0 : index
    %c0_36 = arith.constant 0 : index
    %338 = vector.load %arg6[%c0_34, %c0_35, %c0_36] : memref<1x128x32xf32, #tpu.memory_space<vmem>>, vector<1x128x32xf32>
    %339 = vector.shape_cast %338 : vector<1x128x32xf32> to vector<128x32xf32>
    %cst_37 = arith.constant dense<0.000000e+00> : vector<16x32xf32>
    %340 = tpu.matmul %337, %339, %cst_37 {dimension_numbers = #tpu.dot_dimension_numbers<[1], [0], [0], [1], [0, 0, 1, 1], [], []>} : vector<16x128xf32>, vector<128x32xf32>, vector<16x32xf32> -> vector<16x32xf32>
    %341 = arith.negf %336 : vector<16x32xf32>
    %342 = math.exp %341 : vector<16x32xf32>
    %cst_38 = arith.constant 1.000000e+00 : f32
    %343 = vector.broadcast %cst_38 : f32 to vector<16x32xf32>
    %344 = arith.addf %343, %342 : vector<16x32xf32>
    %345 = arith.divf %343, %344 : vector<16x32xf32>
    %346 = arith.mulf %345, %340 : vector<16x32xf32>
    %347 = vector.shape_cast %346 : vector<16x32xf32> to vector<2x8x32xf32>
    %348 = arith.addf %302, %347 : vector<2x8x32xf32>
    %c0_39 = arith.constant 0 : index
    %c0_40 = arith.constant 0 : index
    %c0_41 = arith.constant 0 : index
    %349 = vector.load %arg9[%c0_39, %c0_40, %c0_41] : memref<2x8x32xf32, #tpu.memory_space<vmem>>, vector<2x8x32xf32>
    tpu.vector_store %arg9[%c0_39, %c0_40, %c0_41], %348 {strides = array<i32>} : memref<2x8x32xf32, #tpu.memory_space<vmem>>, vector<2x8x32xf32>,
    %c0_42 = arith.constant 0 : index
    %c0_43 = arith.constant 0 : index
    %c0_44 = arith.constant 0 : index
    %350 = vector.load %arg7[%c0_42, %c0_43, %c0_44] : memref<2x8x32xf32, #tpu.memory_space<vmem>>, vector<2x8x32xf32>
    tpu.vector_store %arg7[%c0_42, %c0_43, %c0_44], %348 {strides = array<i32>} : memref<2x8x32xf32, #tpu.memory_space<vmem>>, vector<2x8x32xf32>,
    %351 = vector.extract_strided_slice %34 {offsets = [0, 7, 0], sizes = [2, 1, 32], strides = [1, 1, 1]} : vector<2x8x32xf32> to vector<2x1x32xf32>
    %352 = vector.shape_cast %284 : vector<2x32xf32> to vector<2x1x32xf32>
    %353 = vector.shape_cast %286 : vector<2x32xf32> to vector<2x1x32xf32>
    %354 = vector.shape_cast %277 : vector<2x32xf32> to vector<2x1x32xf32>
    %355 = vector.extract_strided_slice %324 {offsets = [0, 7, 0], sizes = [2, 1, 32], strides = [1, 1, 1]} : vector<2x8x32xf32> to vector<2x1x32xf32>
    %356 = tpu.concatenate %351, %352, %353, %354, %355 in 1 : vector<2x1x32xf32>, vector<2x1x32xf32>, vector<2x1x32xf32>, vector<2x1x32xf32>, vector<2x1x32xf32> -> vector<2x5x32xf32>
    %c0_45 = arith.constant 0 : index
    %c0_46 = arith.constant 0 : index
    %c0_47 = arith.constant 0 : index
    %c0_48 = arith.constant 0 : index
    %357 = vector.load %arg8[%c0_45, %c0_46, %c0_47, %c0_48] : memref<1x2x5x32xf32, #tpu.memory_space<vmem>>, vector<1x2x5x32xf32>
    %358 = vector.shape_cast %357 : vector<1x2x5x32xf32> to vector<2x5x32xf32>
    %359 = vector.shape_cast %356 : vector<2x5x32xf32> to vector<1x2x5x32xf32>
    tpu.vector_store %arg8[%c0_45, %c0_46, %c0_47, %c0_48], %359 {strides = array<i32>} : memref<1x2x5x32xf32, #tpu.memory_space<vmem>>, vector<1x2x5x32xf32>,
    return
  }
  func.func @transform_0(%arg0: i32) -> (i32, i32, i32) {
    %c0_i32 = arith.constant 0 : i32
    %c0_i32_0 = arith.constant 0 : i32
    %c0_i32_1 = arith.constant 0 : i32
    %c0_i32_2 = arith.constant 0 : i32
    return %c0_i32, %c0_i32_0, %c0_i32_1 : i32, i32, i32
  }
  func.func @transform_1(%arg0: i32) -> (i32, i32, i32) {
    %c0_i32 = arith.constant 0 : i32
    %c0_i32_0 = arith.constant 0 : i32
    %c0_i32_1 = arith.constant 0 : i32
    return %arg0, %c0_i32, %c0_i32_0 : i32, i32, i32
  }
  func.func @transform_2(%arg0: i32) -> (i32, i32, i32) {
    %c0_i32 = arith.constant 0 : i32
    %c0_i32_0 = arith.constant 0 : i32
    %c0_i32_1 = arith.constant 0 : i32
    return %arg0, %c0_i32, %c0_i32_0 : i32, i32, i32
  }
  func.func @transform_3(%arg0: i32) -> (i32, i32, i32) {
    %c0_i32 = arith.constant 0 : i32
    %c0_i32_0 = arith.constant 0 : i32
    %c0_i32_1 = arith.constant 0 : i32
    return %arg0, %c0_i32, %c0_i32_0 : i32, i32, i32
  }
  func.func @transform_4(%arg0: i32) -> (i32, i32, i32) {
    %c0_i32 = arith.constant 0 : i32
    %c0_i32_0 = arith.constant 0 : i32
    %c0_i32_1 = arith.constant 0 : i32
    return %arg0, %c0_i32, %c0_i32_0 : i32, i32, i32
  }
  func.func @transform_5(%arg0: i32) -> (i32, i32, i32) {
    %c0_i32 = arith.constant 0 : i32
    %c0_i32_0 = arith.constant 0 : i32
    %c0_i32_1 = arith.constant 0 : i32
    return %arg0, %c0_i32, %c0_i32_0 : i32, i32, i32
  }
  func.func @transform_6(%arg0: i32) -> (i32, i32, i32) {
    %c0_i32 = arith.constant 0 : i32
    %c0_i32_0 = arith.constant 0 : i32
    %c0_i32_1 = arith.constant 0 : i32
    %c0_i32_2 = arith.constant 0 : i32
    return %c0_i32, %c0_i32_0, %c0_i32_1 : i32, i32, i32
  }
  func.func @transform_7(%arg0: i32) -> (i32, i32, i32, i32) {
    %c0_i32 = arith.constant 0 : i32
    %c0_i32_0 = arith.constant 0 : i32
    %c0_i32_1 = arith.constant 0 : i32
    %c0_i32_2 = arith.constant 0 : i32
    return %arg0, %c0_i32, %c0_i32_0, %c0_i32_1 : i32, i32, i32, i32
  }
}

</mosaic_0001>

<bundles_post_ra>
// kernel: _rwkv_stack_impl.1
= control target key start
LH: loop header
LB: loop body
LE: loop exit
PB: predicated region body
PF: predicated region fallthrough
CT: control target
= control target key end

     0   :  { %13 = vsyncpa [#allocation4], 0  ;;  %s2278_s24 = smov 0   ;;  %s3066_s0 = inlined_call_operand.vmem [shape: f32[2,8,32], index: 0, kind: input, shape index: {}]   ;;  %s3067_s1 = inlined_call_operand.vmem [shape: f32[2,8,32], index: 1, kind: input, shape index: {}]   ;;  %s3068_s2 = inlined_call_operand.vmem [shape: f32[2,64,96], index: 2, kind: input, shape index: {}]   ;;  %s3069_s3 = inlined_call_operand.vmem [shape: f32[2,32,32], index: 3, kind: input, shape index: {}]   ;;  %s3070_s4 = inlined_call_operand.vmem [shape: f32[2,64,160], index: 4, kind: input, shape index: {}]   ;;  %s3071_s5 = inlined_call_operand.vmem [shape: f32[2,128,32], index: 5, kind: input, shape index: {}]   ;;  %s3072_s6 = inlined_call_operand.hbm [shape: f32[2,8,32], index: 6, kind: output, shape index: {0}]   ;;  %s3073_s7 = inlined_call_operand.vmem [shape: f32[2,2,5,32], index: 7, kind: output, shape index: {1}]  }
   0x1 LB: > { %s2284_s25 = sadd.s32 4294967295, %s2228_s24   ;;  %p1913_p0 = scmp.ge.s32.totalorder %s2228_s24, 1  ;;  %s2228_s24 = sphi %s2278_s24, %s19_s24  }
   0x2   : > { %p275_p1 = scmp.lt.s32.totalorder %s2228_s24, 3 }
   0x4   : > { %p276_p2 = pnand %p1913_p0, %p275_p1 }
   0x6   : > { %279 = sbr.rel (%p276_p2) target bundleno = 2182 (0x886), region = 44 }
   0xb   : > { %p326_p3 = scmp.lt.s32.totalorder %s2284_s25, 1  ;;  %p1925_p4 = scmp.ne.s32.totalorder %s2284_s25, 0 }
   0xd   : > { %s327_s26 = scalar_select %p326_p3, %s2284_s25, 1 }
   0xf   : > { %s1914_s27 = sshll.u32 %s327_s26, 3  ;;  %s1940_s28 = sshll.u32 %s327_s26, 6 }
  0x10   : > { %s329_s8 = scalar_lea.vmem %s3067_s1, %s1914_s27  ;;  %s2296_s11 = scalar_lea.vmem %s3068_s2, %s1940_s28 }
  0x11   : > { %s1941_s12 = sshll.u32 %s327_s26, 5  ;;  %s1942_s13 = sshll.u32 %s327_s26, 7  ;;  %v2298_v0 = vld [vmem:[%s329_s8] sm:$0xff] }
  0x12   : > { %3081 = vst [vmem:[#allocation6_spill] sm:$0xff] %v2298_v0  ;;  %s2303_s16 = scalar_lea.vmem %s3069_s3, %s1941_s12  ;;  %s2308_s19 = scalar_lea.vmem %s3070_s4, %s1942_s13  ;;  %v356_v1 = vmul.f32 1.442695, %v2298_v0 }
  0x13   : > { %s2314_s22 = scalar_lea.vmem %s3071_s5, %s1942_s13  ;;  %s1944_s23 = sshll.u32 %s327_s26, 4 }
  0x14   : > { %s2319_s29 = scalar_lea.vmem %s3073_s7, %s1944_s23  ;;  %2066 = vpow2.f32 %v356_v1 }
  0x1d   : > { %361 = sbr.rel (%p1925_p4) target bundleno = 348 (0x15c), region = 48 }
  0x21   : > { %v2321_v2 = vpop.eup %2066 }
  0x22   : > { %v362_v3 = vld [vmem:[%s3066_s0] sm:$0xff]  ;;  %vm364_vm0 = vcmask 261120   ;;  %v363_v4 = vld [vmem:[%s3066_s0 + $0x8] sm:$0xff]  ;;  %v392_v21 = vlaneseq }
  0x23   : > { %v365_v5 = vsel %vm364_vm0, %v362_v3, 0.0  ;;  %v368_v6 = vsel %vm364_vm0, %v363_v4, 0.0 }
  0x24   : > { %366 = vadd.xlane.f32.xlu0 %v365_v5  ;;  %v393_v24 = vshrl.u32 %v392_v21, 7 }
  0x26   : > { %v394_v25 = vsub.s32 0, %v393_v24  ;;  %v400_v26 = vsub.s32 1, %v393_v24 }
  0x28   : > { %369 = vadd.xlane.f32.xlu0 %v368_v6  ;;  %v395_v27 = vrot.slane %v2298_v0, %v394_v25  ;;  %v401_v29 = vrot.slane %v2298_v0, %v400_v26 }
  0xad   : > { %v367_v7 = vpop.xlane.xlu0 %366 }
  0xae   : > { %v372_v8 = vmul.f32 0.03125, %v367_v7 }
  0xb0   : > { %v374_v9 = vsub.f32 %v362_v3, %v372_v8 }
  0xb1   : > { %v370_v10 = vpop.xlane.xlu0 %369 }
  0xb2   : > { %v373_v11 = vmul.f32 0.03125, %v370_v10  ;;  %v376_v12 = vmul.f32 %v374_v9, %v374_v9 }
  0xb4   : > { %v375_v13 = vsub.f32 %v363_v4, %v373_v11  ;;  %v378_v14 = vsel %vm364_vm0, %v376_v12, 0.0 }
  0xb5   : > { %379 = vadd.xlane.f32.xlu1 %v378_v14 }
  0xb6   : > { %v377_v15 = vmul.f32 %v375_v13, %v375_v13 }
  0xb8   : > { %v381_v16 = vsel %vm364_vm0, %v377_v15, 0.0 }
  0xb9   : > { %382 = vadd.xlane.f32.xlu1 %v381_v16 }
 0x13e   : > { %v380_v17 = vpop.xlane.xlu1 %379 }
 0x13f   : > { %v384_v18 = vmul.f32 0.03125, %v380_v17 }
 0x141   : > { %v386_v19 = vadd.f32 1e-05, %v384_v18 }
 0x142   : > { %v383_v20 = vpop.xlane.xlu1 %382 }
 0x143   : > { %2068 = vrsqrt.f32 %v386_v19  ;;  %v385_v22 = vmul.f32 0.03125, %v383_v20 }
 0x145   : > { %v387_v23 = vadd.f32 1e-05, %v385_v22 }
 0x147   : > { %2070 = vrsqrt.f32 %v387_v23 }
 0x150   : > { %v2069_v28 = vpop.eup %2068 }
 0x151   : > { %v390_v30 = vmul.f32 %v2069_v28, %v374_v9 }
 0x153   : > { %v396_v31 = vmul.f32 %v395_v27, %v390_v30 }
 0x154   : > { %v2071_v32 = vpop.eup %2070 }
 0x155   : > { %v402_v33 = vadd.f32 %v401_v29, %v396_v31  ;;  %v391_v34 = vmul.f32 %v2071_v32, %v375_v13 }
 0x157   : > { %404 = vst.msk [vmem:[#allocation2] sm:$0xff] %vm364_vm0, %v402_v33  ;;  %v397_v35 = vmul.f32 %v395_v27, %v391_v34 }
 0x159   : > { %v403_v36 = vadd.f32 %v401_v29, %v397_v35 }
 0x15b   : > { %405 = vst.msk [vmem:[#allocation2 + $0x8] sm:$0xff] %vm364_vm0, %v403_v36 }
 0x15c PF: > { %vm408_vm1 = vcmask 261120   ;;  %v474_v51 = vld [vmem:[%s2296_s11 + $0x38] sm:$0xff]  ;;  %v473_v52 = vld [vmem:[%s2296_s11 + $0x30] sm:$0xff]  ;;  %v472_v53 = vld [vmem:[%s2296_s11 + $0x28] sm:$0xff]  ;;  %v436_v62 = vlaneseq  ;;  %vm454_vm2 = vcmask 1040384   ;;  %s2230_s26 = smov 32  }
 0x15d   : > { %1979 = vmatprep.subr.mxu1 %v474_v51  ;;  %v471_v54 = vld [vmem:[%s2296_s11 + $0x20] sm:$0xff]  ;;  %v470_v55 = vld [vmem:[%s2296_s11 + $0x18] sm:$0xff]  ;;  %v469_v56 = vld [vmem:[%s2296_s11 + $0x10] sm:$0xff]  ;;  %vm475_vm3 = vcmask 523264   ;;  %vm576_vm4 = vcmask 1041409   ;;  %s2232_s12 = smov 64  }
 0x15e   : > { %v406_v37 = vld [vmem:[#allocation2] sm:$0xff]  ;;  %1980 = vmatpush3.msra.mxu1 %v474_v51  ;;  %v2348_v1 = vshrl.u32 %v436_v62, 7  ;;  %v468_v4 = vld [vmem:[%s2296_s11 + $0x8] sm:$0xff]  ;;  %vm1282_vm5 = vcmask 1041408   ;;  %vm1285_vm6 = vcmask 1042432   ;;  %vm1288_vm7 = vcmask 1043456  }
 0x15f   : > { %v409_v39 = vsel %vm408_vm1, %v406_v37, 0.0  ;;  %1981 = vmatprep.subr.mxu1 %v473_v52  ;;  %v467_v6 = vld [vmem:[%s2296_s11] sm:$0xff]  ;;  %s2231_s11 = smov 96   ;;  %vm1291_vm8 = vcmask 1044480   ;;  %vm1294_vm9 = vcmask 1045504   ;;  %vm1297_vm10 = vcmask 1046528  }
 0x160   : > { %410 = vadd.xlane.f32.xlu0 %v409_v39  ;;  %1982 = vmatpush3.msra.mxu1 %v473_v52  ;;  %v438_v3 = vsub.s32 2, %v2348_v1  ;;  %v444_v5 = vsub.s32 3, %v2348_v1  ;;  %v598_v25 = vsub.s32 6, %v2348_v1  ;;  %v571_v29 = vsub.s32 7, %v2348_v1  ;;  %s2235_s13 = smov [#allocation3]   ;;  %p2048_p5 = scmp.eq.s32.totalorder %s2284_s25, 1 }
 0x161   : > { %1983 = vmatprep.subr.mxu1 %v472_v53  ;;  %vm1777_vm11 = vcmask 258048   ;;  %s1791_s14 = sshll.u32 %s2235_s13, 4  ;;  %s1792_s14 = int_to_ptr.vmem [resolvable:$true] %s1791_s14 }
 0x162   : > { %v407_v38 = vld [vmem:[#allocation2 + $0x8] sm:$0xff]  ;;  %1984 = vmatpush3.msra.mxu1 %v472_v53  ;;  %v439_v7 = vrot.slane %v2298_v0, %v438_v3  ;;  %v445_v10 = vrot.slane %v2298_v0, %v444_v5  ;;  %v2378_v26 = vrot.slane %v2321_v2, %v598_v25  ;;  %v2403_v35 = vrot.slane %v2298_v0, %v571_v29  ;;  %s2194_s15 = scalar_lea.vmem %s1792_s14, 256  ;;  %p2201_p9 = scmp.lt.s32.totalorder %s1792_s14, %s1792_s14 }
 0x163   : > { %v412_v40 = vsel %vm408_vm1, %v407_v38, 0.0  ;;  %1985 = vmatprep.subr.mxu1 %v471_v54  ;;  %p2195_p6 = scmp.ne.s32.totalorder %s1792_s14, %s2194_s15  ;;  %p2202_p10 = scmp.lt.s32.totalorder %s2194_s15, %s2194_s15 }
 0x164   : > { %413 = vadd.xlane.f32.xlu0 %v412_v40  ;;  %1986 = vmatpush3.msra.mxu1 %v471_v54  ;;  %v600_v28 = vsub.f32 0.0, %v2378_v26 }
 0x165   : > { %1987 = vmatprep.subr.mxu1 %v470_v55  ;;  %p2196_p7 = pnand %p2195_p6, %p2048_p5  ;;  %p2203_p11 = por %p2202_p10, %p2201_p9 }
 0x166   : > { %1988 = vmatpush3.msra.mxu1 %v470_v55 }
 0x167   : > { %1989 = vmatprep.subr.mxu1 %v469_v56  ;;  %p2197_p8 = pneg %p2196_p7 }
 0x168   : > { %1990 = vmatpush3.msra.mxu1 %v469_v56 }
 0x169   : > { %1991 = vmatprep.subr.mxu1 %v468_v4  ;;  %p2204_p12 = pnand %p2203_p11, %p2197_p8 }
 0x16a   : > { %1992 = vmatpush3.msra.mxu1 %v468_v4 }
 0x16b   : > { %1993 = vmatprep.subr.mxu1 %v467_v6 }
 0x16c   : > { %1994 = vmatpush3.msra.mxu1 %v467_v6 }
 0x1e9   : > { %v411_v41 = vpop.xlane.xlu0 %410 }
 0x1ea   : > { %v416_v42 = vmul.f32 0.03125, %v411_v41 }
 0x1ec   : > { %v418_v43 = vsub.f32 %v406_v37, %v416_v42 }
 0x1ed   : > { %v414_v44 = vpop.xlane.xlu0 %413 }
 0x1ee   : > { %v417_v45 = vmul.f32 0.03125, %v414_v44  ;;  %v420_v46 = vmul.f32 %v418_v43, %v418_v43 }
 0x1f0   : > { %v419_v47 = vsub.f32 %v407_v38, %v417_v45  ;;  %v422_v48 = vsel %vm408_vm1, %v420_v46, 0.0 }
 0x1f1   : > { %423 = vadd.xlane.f32.xlu1 %v422_v48 }
 0x1f2   : > { %v421_v49 = vmul.f32 %v419_v47, %v419_v47 }
 0x1f4   : > { %v425_v50 = vsel %vm408_vm1, %v421_v49, 0.0 }
 0x1f5   : > { %426 = vadd.xlane.f32.xlu1 %v425_v50 }
 0x27a   : > { %v424_v57 = vpop.xlane.xlu1 %423 }
 0x27b   : > { %v428_v58 = vmul.f32 0.03125, %v424_v57 }
 0x27d   : > { %v430_v59 = vadd.f32 1e-05, %v428_v58 }
 0x27e   : > { %v427_v60 = vpop.xlane.xlu1 %426 }
 0x27f   : > { %2072 = vrsqrt.f32 %v430_v59  ;;  %v429_v61 = vmul.f32 0.03125, %v427_v60 }
 0x281   : > { %v431_v63 = vadd.f32 1e-05, %v429_v61 }
 0x283   : > { %2074 = vrsqrt.f32 %v431_v63 }
 0x28c   : > { %v2073_v8 = vpop.eup %2072 }
 0x28d   : > { %v434_v9 = vmul.f32 %v2073_v8, %v418_v43 }
 0x28f   : > { %v440_v11 = vmul.f32 %v439_v7, %v434_v9 }
 0x290   : > { %v2075_v12 = vpop.eup %2074 }
 0x291   : > { %v2356_v13 = vadd.f32 %v445_v10, %v440_v11  ;;  %v435_v14 = vmul.f32 %v2075_v12, %v419_v47 }
 0x293   : > { %3082 = vst [vmem:[#allocation7_spill] sm:$0xff] %v2356_v13  ;;  %v3075_v15 = vrot.slane %v2356_v13, 7  ;;  %v441_v16 = vmul.f32 %v439_v7, %v435_v14 }
 0x295   : > { %v455_v17 = vsel %vm454_vm2, 0.0, %v3075_v15  ;;  %v2362_v18 = vadd.f32 %v445_v10, %v441_v16 }
 0x296   : > { %459 = vrot.lane.b32.xlu0 %v455_v17, %s2230_s26 }
 0x297   : > { %3083 = vst [vmem:[#allocation8_spill] sm:$0xff] %v2362_v18  ;;  %v3074_v19 = vrot.slane %v2362_v18, 7 }
 0x299   : > { %v456_v20 = vsel %vm454_vm2, 0.0, %v3074_v19 }
 0x29a   : > { %461 = vrot.lane.b32.xlu1 %v456_v20, %s2230_s26 }
 0x308   : > { %v460_v21 = vpop.permute.xlu0 %459 }
 0x309   : > { %v465_v22 = vsel %vm408_vm1, %v2356_v13, %v460_v21 }
 0x30a   : > { %1995 = vmatprep.mubr.msk.f32.mxu1 %vm475_vm3, %v465_v22 }
 0x30c   : > { %v462_v23 = vpop.permute.xlu1 %461 }
 0x30d   : > { %v466_v24 = vsel %vm408_vm1, %v2362_v18, %v462_v23  ;;  %v2233_v18 = vmov 1966171168  }
 0x30e   : > { %1996 = vmatmul.mubr.msk.f32.vlgmr.msra.gmra.mxu1 %vm475_vm3, %v466_v24  ;;  %v1026_v13 = vunpack.c.l.s4 %v2233_v18 }
 0x3ce   : > { %v2380_v27 = vpop.f32.mrf.mxu1 }
 0x3cf   : > { %618 = vrot.lane.b32.xlu1 %v2380_v27, %s2231_s11  ;;  %v575_v30 = vrot.slane %v2380_v27, 7  ;;  %v689_v37 = vrot.slane %v2380_v27, 1  ;;  %v801_v44 = vrot.slane %v2380_v27, 3  ;;  %v745_v47 = vrot.slane %v2380_v27, 2 }
 0x3d0   : > { %v2387_v31 = vpop.f32.mrf.mxu1  ;;  %v913_v3 = vrot.slane %v2380_v27, 5  ;;  %v857_v7 = vrot.slane %v2380_v27, 4  ;;  %v969_v29 = vrot.slane %v2380_v27, 6 }
 0x3d1   : > { %v2391_v32 = vsel %vm576_vm4, %v575_v30, %v2387_v31  ;;  %v636_v2 = vrot.slane %v2387_v31, 1  ;;  %v688_v33 = vrot.slane %v2387_v31, 2  ;;  %v800_v38 = vrot.slane %v2387_v31, 4 }
 0x3d2   : > { %588 = vrot.lane.b32.xlu0 %v2391_v32, %s2231_s11  ;;  %v2400_v34 = vmax.f32 %v600_v28, %v2391_v32  ;;  %v744_v41 = vrot.slane %v2387_v31, 3  ;;  %v912_v51 = vrot.slane %v2387_v31, 6  ;;  %v856_v55 = vrot.slane %v2387_v31, 5 }
 0x3d3   : > { %616 = vrot.lane.b32.xlu1 %v2387_v31, %s2231_s11  ;;  %v637_v36 = vsel %vm576_vm4, %v2380_v27, %v636_v2  ;;  %v690_v43 = vsel %vm576_vm4, %v689_v37, %v688_v33  ;;  %v802_v50 = vsel %vm576_vm4, %v801_v44, %v800_v38  ;;  %v968_v21 = vrot.slane %v2387_v31, 7 }
 0x3d4   : > { %v606_v39 = vrot.slane %v2400_v34, 1  ;;  %v2414_v40 = vsub.f32 %v2400_v34, %v2378_v26  ;;  %v2418_v42 = vadd.f32 %v637_v36, %v2403_v35  ;;  %v609_v45 = vsub.f32 %v2387_v31, %v2400_v34 }
 0x3d5   : > { %v2438_v53 = vadd.f32 %v690_v43, %v2403_v35  ;;  %v746_v54 = vsel %vm576_vm4, %v745_v47, %v744_v41  ;;  %v2475_v10 = vsel %vm576_vm4, %v913_v3, %v912_v51  ;;  %v858_v14 = vsel %vm576_vm4, %v857_v7, %v856_v55 }
 0x3d6   : > { %v610_v46 = vsub.f32 %v2380_v27, %v606_v39  ;;  %648 = vrot.lane.b32.xlu0 %v637_v36, %s2231_s11  ;;  %v2429_v48 = vmax.f32 %v2418_v42, %v2400_v34  ;;  %v2432_v49 = vmax.f32 %v2414_v40, %v637_v36  ;;  %v611_v60 = vmul.f32 1.442695, %v609_v45 }
 0x3d7   : > { %701 = vrot.lane.b32.xlu1 %v690_v43, %s2231_s11  ;;  %v2472_v9 = vadd.f32 %v746_v54, %v2403_v35  ;;  %v2505_v38 = vsel %vm576_vm4, %v969_v29, %v968_v21  ;;  %v2518_v45 = vadd.f32 %v802_v50, %v2403_v35  ;;  %v2524_v51 = vadd.f32 %v858_v14, %v2403_v35 }
 0x3d8   : > { %v613_v52 = vmul.f32 1.442695, %v610_v46  ;;  %v641_v56 = vsub.f32 %v2400_v34, %v2429_v48  ;;  %v644_v57 = vsub.f32 %v2418_v42, %v2429_v48  ;;  %v659_v58 = vsub.f32 %v2414_v40, %v2432_v49 }
 0x3d9   : > { %v663_v59 = vrot.slane %v2432_v49, 7  ;;  %v667_v61 = vsub.f32 %v2380_v27, %v2432_v49  ;;  %v2453_v62 = vsub.f32 %v2432_v49, %v2378_v26  ;;  %v2457_v63 = vmax.f32 %v2438_v53, %v2432_v49 }
 0x3da   : > { %813 = vrot.lane.b32.xlu0 %v802_v50, %s2231_s11  ;;  %2076 = vpow2.f32 %v613_v52  ;;  %v642_v39 = vmul.f32 1.442695, %v641_v56  ;;  %v1929_v46 = vmul.f32 -1.442695, %v2380_v27  ;;  %v645_v55 = vmul.f32 1.442695, %v644_v57 }
 0x3db   : > { %757 = vrot.lane.b32.xlu1 %v746_v54, %s2231_s11  ;;  %v666_v4 = vsub.f32 %v2387_v31, %v663_v59  ;;  %v694_v5 = vsub.f32 %v2432_v49, %v2457_v63  ;;  %v697_v6 = vsub.f32 %v2438_v53, %v2457_v63  ;;  %v2469_v8 = vmax.f32 %v2453_v62, %v690_v43 }
 0x3dc   : > { %2078 = vpow2.f32 %v611_v60  ;;  %v670_v12 = vmul.f32 1.442695, %v667_v61  ;;  %v1928_v3 = vmul.f32 -1.442695, %v2387_v31  ;;  %v602_v57 = vsub.f32 %v600_v28, %v2400_v34 }
 0x3dd   : > { %v668_v11 = vmul.f32 1.442695, %v666_v4  ;;  %v712_v16 = vsub.f32 %v2453_v62, %v2469_v8  ;;  %v716_v17 = vrot.slane %v2469_v8, 6  ;;  %v717_v20 = vrot.slane %v2469_v8, 7 }
 0x3de   : > { %925 = vrot.lane.b32.xlu0 %v2475_v10, %s2231_s11  ;;  %v2488_v22 = vsub.f32 %v2469_v8, %v2378_v26  ;;  %v2492_v23 = vmax.f32 %v2472_v9, %v2469_v8 }
 0x3df   : > { %869 = vrot.lane.b32.xlu1 %v858_v14, %s2231_s11  ;;  %2080 = vpow2.f32 %v668_v11  ;;  %v720_v24 = vsub.f32 %v2387_v31, %v716_v17  ;;  %v721_v25 = vsub.f32 %v2380_v27, %v717_v20 }
 0x3e0   : > { %v750_v30 = vsub.f32 %v2469_v8, %v2492_v23  ;;  %v753_v2 = vsub.f32 %v2472_v9, %v2492_v23  ;;  %v2502_v33 = vmax.f32 %v2488_v22, %v746_v54  ;;  %2082 = vpow2.f32 %v670_v12 }
 0x3e1   : > { %v722_v36 = vmul.f32 1.442695, %v720_v24  ;;  %v724_v37 = vmul.f32 1.442695, %v721_v25  ;;  %v660_v24 = vmul.f32 1.442695, %v659_v58 }
 0x3e2   : > { %v768_v41 = vsub.f32 %v2488_v22, %v2502_v33  ;;  %v772_v42 = vrot.slane %v2502_v33, 5  ;;  %v773_v43 = vrot.slane %v2502_v33, 6  ;;  %v2515_v44 = vsub.f32 %v2502_v33, %v2378_v26 }
 0x3e3   : > { %981 = vrot.lane.b32.xlu1 %v2505_v38, %s2231_s11  ;;  %2084 = vpow2.f32 %v722_v36  ;;  %v2533_v56 = vmax.f32 %v2518_v45, %v2502_v33  ;;  %v751_v62 = vmul.f32 1.442695, %v750_v30 }
 0x3e4   : > { %2086 = vpow2.f32 %v724_v37  ;;  %v776_v47 = vsub.f32 %v2387_v31, %v772_v42  ;;  %v777_v48 = vsub.f32 %v2380_v27, %v773_v43  ;;  %v2527_v52 = vmax.f32 %v2515_v44, %v802_v50 }
 0x3e5   : > { %2088 = vpow2.f32 %v642_v39  ;;  %v806_v17 = vsub.f32 %v2502_v33, %v2533_v56  ;;  %v809_v34 = vsub.f32 %v2518_v45, %v2533_v56  ;;  %v603_v37 = vmul.f32 1.442695, %v602_v57 }
 0x3e6   : > { %v778_v59 = vmul.f32 1.442695, %v776_v47  ;;  %v780_v60 = vmul.f32 1.442695, %v777_v48  ;;  %v2537_v61 = vmax.f32 %v2524_v51, %v2527_v52  ;;  %v2542_v50 = vsub.f32 %v2527_v52, %v2378_v26 }
 0x3e7   : > { %v2529_v54 = vpop.eup %2076  ;;  %2090 = vpow2.f32 %v1929_v46  ;;  %v824_v40 = vsub.f32 %v2515_v44, %v2527_v52  ;;  %v695_v42 = vmul.f32 1.442695, %v694_v5  ;;  %v698_v43 = vmul.f32 1.442695, %v697_v6  ;;  %v1312_v44 = vld [vmem:[%s2303_s16 + $0x10] sm:$0xff] }
 0x3e8   : > { %v632_v4 = vrot.slane %v2529_v54, 7  ;;  %2092 = vpow2.f32 %v778_v59  ;;  %v862_v11 = vsub.f32 %v2527_v52, %v2537_v61  ;;  %v865_v12 = vsub.f32 %v2524_v51, %v2537_v61 }
 0x3e9   : > { %v2548_v7 = vpop.eup %2078  ;;  %2094 = vpow2.f32 %v780_v60  ;;  %v2557_v20 = vmax.f32 %v2542_v50, %v858_v14  ;;  %v713_v48 = vmul.f32 1.442695, %v712_v16  ;;  %v828_v8 = vrot.slane %v2527_v52, 4 }
 0x3ea   : > { %v2561_v28 = vsel %vm576_vm4, %v632_v4, %v2548_v7  ;;  %2096 = vpow2.f32 %v1928_v3  ;;  %v829_v30 = vrot.slane %v2527_v52, 5 }
 0x3eb   : > { %v880_v25 = vsub.f32 %v2542_v50, %v2557_v20  ;;  %v884_v14 = vrot.slane %v2557_v20, 3  ;;  %v885_v29 = vrot.slane %v2557_v20, 4  ;;  %v2576_v36 = vsub.f32 %v2557_v20, %v2378_v26 }
 0x3ec   : > { %v2565_v21 = vpop.eup %2080  ;;  %2098 = vpow2.f32 %v645_v55  ;;  %v2596_v55 = vadd.f32 %v2505_v38, %v2403_v35  ;;  %v832_v22 = vsub.f32 %v2387_v31, %v828_v8  ;;  %v807_v8 = vmul.f32 1.442695, %v806_v17 }
 0x3ed   : > { %v684_v39 = vrot.slane %v2565_v21, 1  ;;  %v2581_v58 = vpop.eup %2082  ;;  %v888_v46 = vsub.f32 %v2387_v31, %v884_v14  ;;  %v889_v47 = vsub.f32 %v2380_v27, %v885_v29  ;;  %v2600_v49 = vmax.f32 %v2576_v36, %v2475_v10 }
 0x3ee   : > { %2100 = vpow2.f32 %v660_v24  ;;  %v754_v29 = vmul.f32 1.442695, %v753_v2  ;;  %v825_v17 = vmul.f32 1.442695, %v824_v40 }
 0x3ef   : > { %v2604_v53 = vsel %vm576_vm4, %v2581_v58, %v684_v39  ;;  %v890_v5 = vmul.f32 1.442695, %v888_v46  ;;  %v892_v6 = vmul.f32 1.442695, %v889_v47  ;;  %v2615_v59 = vmax.f32 %v2596_v55, %v2600_v49 }
 0x3f0   : > { %v2606_v63 = vpop.eup %2084  ;;  %v2619_v60 = vsub.f32 %v2600_v49, %v2378_v26  ;;  %2102 = vpow2.f32 %v603_v37  ;;  %v833_v39 = vsub.f32 %v2380_v27, %v829_v30  ;;  %v769_v47 = vmul.f32 1.442695, %v768_v41 }
 0x3f1   : > { %v2611_v16 = vpop.eup %2086  ;;  %v739_v3 = vrot.slane %v2606_v63, 2  ;;  %2104 = vpow2.f32 %v890_v5  ;;  %v974_v24 = vsub.f32 %v2600_v49, %v2615_v59  ;;  %v977_v26 = vsub.f32 %v2596_v55, %v2615_v59 }
 0x3f2   : > { %v740_v57 = vrot.slane %v2611_v16, 1  ;;  %v2625_v4 = vpop.eup %2088  ;;  %2106 = vpow2.f32 %v892_v6  ;;  %v2633_v14 = vmax.f32 %v2619_v60, %v2505_v38 }
 0x3f3   : > { %2108 = vpow2.f32 %v695_v42 }
 0x3f4   : > { %v2639_v37 = vsel %vm576_vm4, %v740_v57, %v739_v3  ;;  %v2091_v46 = vpop.eup %2090  ;;  %2110 = vpow2.f32 %v698_v43  ;;  %v992_v38 = vsub.f32 %v2619_v60, %v2633_v14  ;;  %v996_v42 = vrot.slane %v2633_v14, 1 }
 0x3f5   : > { %v2648_v5 = vpop.eup %2092  ;;  %2112 = vpow2.f32 %v713_v48  ;;  %v997_v9 = vrot.slane %v2633_v14, 2  ;;  %v564_v23 = vadd.f32 1.0, %v2091_v46  ;;  %v2658_v3 = vadd.f32 %v2475_v10, %v2403_v35 }
 0x3f6   : > { %v2651_v2 = vpop.eup %2094  ;;  %2114 = vpow2.f32 %v751_v62  ;;  %v1000_v43 = vsub.f32 %v2387_v31, %v996_v42  ;;  %v795_v6 = vrot.slane %v2648_v5, 3  ;;  %v834_v10 = vmul.f32 1.442695, %v832_v22 }
 0x3f7   : > { %v2097_v41 = vpop.eup %2096  ;;  %2116 = vpow2.f32 %v754_v29  ;;  %v1001_v48 = vsub.f32 %v2380_v27, %v997_v9  ;;  %v796_v46 = vrot.slane %v2651_v2, 2  ;;  %v836_v9 = vmul.f32 1.442695, %v833_v39 }
 0x3f8   : > { %2118 = vpow2.f32 %v769_v47  ;;  %v1002_v57 = vmul.f32 1.442695, %v1000_v43  ;;  %v563_v30 = vadd.f32 1.0, %v2097_v41  ;;  %v2672_v47 = vmax.f32 %v2658_v3, %v2557_v20 }
 0x3f9   : > { %v2662_v62 = vpop.eup %2098  ;;  %v1004_v42 = vmul.f32 1.442695, %v1001_v48  ;;  %2120 = vrcp.f32 %v564_v23  ;;  %v2668_v29 = vsel %vm576_vm4, %v796_v46, %v795_v6  ;;  %v936_v23 = vsub.f32 %v2576_v36, %v2600_v49 }
 0x3fa   : > { %2122 = vpow2.f32 %v1002_v57  ;;  %v940_v43 = vrot.slane %v2600_v49, 2  ;;  %v918_v6 = vsub.f32 %v2557_v20, %v2672_v47  ;;  %v921_v22 = vsub.f32 %v2658_v3, %v2672_v47  ;;  %v1313_v57 = vld [vmem:[%s2303_s16 + $0x18] sm:$0xff] }
 0x3fb   : > { %2124 = vpow2.f32 %v1004_v42  ;;  %v2677_v33 = vpop.eup %2100  ;;  %v863_v36 = vmul.f32 1.442695, %v862_v11  ;;  %v941_v39 = vrot.slane %v2600_v49, 3  ;;  %v810_v3 = vmul.f32 1.442695, %v809_v34  ;;  %1998 = vmatprep.subr.mxu0 %v1313_v57  ;;  %v1311_v42 = vld [vmem:[%s2303_s16 + $0x8] sm:$0xff] }
 0x3fc   : > { %2126 = vrcp.f32 %v563_v30  ;;  %v944_v48 = vsub.f32 %v2387_v31, %v940_v43  ;;  %v881_v11 = vmul.f32 1.442695, %v880_v25  ;;  %1999 = vmatpush3.msra.mxu0 %v1313_v57  ;;  %v866_v20 = vmul.f32 1.442695, %v865_v12  ;;  %v1310_v25 = vld [vmem:[%s2303_s16] sm:$0xff] }
 0x3fd   : > { %v2103_v41 = vpop.eup %2102  ;;  %2128 = vpow2.f32 %v807_v8  ;;  %v945_v46 = vsub.f32 %v2380_v27, %v941_v39  ;;  %2000 = vmatprep.subr.mxu0 %v1312_v44  ;;  %v922_v57 = vmul.f32 1.442695, %v921_v22  ;;  %v978_v60 = vmul.f32 1.442695, %v977_v26 }
 0x3fe   : > { %v2693_v40 = vpop.eup %2104  ;;  %v2695_v30 = vmul.f32 0.0, %v2103_v41  ;;  %2130 = vpow2.f32 %v834_v10  ;;  %v946_v34 = vmul.f32 1.442695, %v944_v48  ;;  %2001 = vmatpush3.msra.mxu0 %v1312_v44  ;;  %v937_v41 = vmul.f32 1.442695, %v936_v23 }
 0x3ff   : > { %v2700_v52 = vpop.eup %2106  ;;  %2132 = vpow2.f32 %v836_v9  ;;  %v907_v31 = vrot.slane %v2693_v40, 5  ;;  %v948_v27 = vmul.f32 1.442695, %v945_v46  ;;  %2002 = vmatprep.subr.mxu0 %v1311_v42  ;;  %v993_v23 = vmul.f32 1.442695, %v992_v38 }
 0x400   : > { %v2708_v8 = vpop.eup %2108  ;;  %v635_v45 = vadd.f32 %v2561_v28, %v2695_v30  ;;  %2134 = vpow2.f32 %v825_v17  ;;  %v908_v56 = vrot.slane %v2700_v52, 4  ;;  %v919_v17 = vmul.f32 1.442695, %v918_v6  ;;  %2003 = vmatpush3.msra.mxu0 %v1311_v42 }
 0x401   : > { %v2713_v50 = vpop.eup %2110  ;;  %2136 = vpow2.f32 %v863_v36  ;;  %2004 = vmatprep.subr.mxu0 %v1310_v25 }
 0x402   : > { %v2719_v10 = vpop.eup %2112  ;;  %v653_v47 = vmul.f32 %v2625_v4, %v635_v45  ;;  %v681_v28 = vmul.f32 %v2677_v33, %v635_v45  ;;  %2138 = vpow2.f32 %v810_v3  ;;  %v2724_v9 = vsel %vm576_vm4, %v908_v56, %v907_v31  ;;  %2005 = vmatpush3.msra.mxu0 %v1310_v25 }
 0x403   : > { %v2726_v43 = vpop.eup %2114  ;;  %2140 = vpow2.f32 %v881_v11 }
 0x404   : > { %v2728_v51 = vpop.eup %2116  ;;  %v2731_v61 = vadd.f32 %v2662_v62, %v653_v47  ;;  %v687_v12 = vadd.f32 %v2604_v53, %v681_v28  ;;  %2142 = vpow2.f32 %v946_v34  ;;  %v975_v53 = vmul.f32 1.442695, %v974_v24 }
 0x405   : > { %v2734_v36 = vpop.eup %2118  ;;  %2144 = vpow2.f32 %v948_v27 }
 0x406   : > { %v2121_v39 = vpop.eup %2120  ;;  %2146 = vpow2.f32 %v866_v20  ;;  %v706_v48 = vmul.f32 %v2708_v8, %v687_v12  ;;  %v736_v6 = vmul.f32 %v2719_v10, %v687_v12 }
 0x407   : > { %v2738_v44 = vpop.eup %2122  ;;  %1304 = vrot.lane.b32.xlu1 %v2121_v39, %s2232_s12  ;;  %2148 = vpow2.f32 %v919_v17 }
 0x408   : > { %v2746_v3 = vpop.eup %2124  ;;  %v1019_v11 = vrot.slane %v2738_v44, 7  ;;  %v2750_v31 = vadd.f32 %v2713_v50, %v706_v48  ;;  %v743_v22 = vadd.f32 %v2639_v37, %v736_v6  ;;  %2150 = vpow2.f32 %v937_v41 }
 0x409   : > { %v2127_v46 = vpop.eup %2126  ;;  %v1020_v49 = vrot.slane %v2746_v3, 6  ;;  %2152 = vpow2.f32 %v922_v57  ;;  %v579_v48 = vadd.f32 %v2391_v32, %v2403_v35 }
 0x40a   : > { %v2754_v24 = vpop.eup %2128  ;;  %1302 = vrot.lane.b32.xlu0 %v2127_v46, %s2232_s12  ;;  %v762_v38 = vmul.f32 %v2726_v43, %v743_v22  ;;  %v792_v42 = vmul.f32 %v2734_v36, %v743_v22  ;;  %2154 = vpow2.f32 %v975_v53 }
 0x40b   : > { %v2761_v45 = vpop.eup %2130  ;;  %v1021_v37 = vsel %vm576_vm4, %v1020_v49, %v1019_v11  ;;  %2156 = vpow2.f32 %v993_v23  ;;  %v580_v32 = vmax.f32 %v579_v48, 0.0 }
 0x40c   : > { %v2764_v56 = vpop.eup %2132  ;;  %v799_v34 = vadd.f32 %v2668_v29, %v792_v42  ;;  %v763_v20 = vadd.f32 %v2728_v51, %v762_v38  ;;  %v851_v55 = vrot.slane %v2761_v45, 4  ;;  %2158 = vpow2.f32 %v978_v60 }
 0x40d   : > { %v2769_v59 = vpop.eup %2134  ;;  %v852_v26 = vrot.slane %v2764_v56, 3  ;;  %v584_v19 = vsub.f32 %v579_v48, %v580_v32 }
 0x40e   : > { %v2772_v27 = vpop.eup %2136  ;;  %v818_v25 = vmul.f32 %v2754_v24, %v799_v34  ;;  %v848_v47 = vmul.f32 %v2769_v59, %v799_v34 }
 0x40f   : > { %v2776_v28 = vpop.eup %2138  ;;  %v853_v17 = vsel %vm576_vm4, %v852_v26, %v851_v55 }
 0x410   : > { %v2779_v29 = vpop.eup %2140  ;;  %v2782_v12 = vadd.f32 %v2776_v28, %v818_v25  ;;  %v855_v41 = vadd.f32 %v853_v17, %v848_v47  ;;  %v581_v17 = vsub.f32 0.0, %v580_v32 }
 0x411   : > { %v2784_v39 = vpop.eup %2142 }
 0x412   : > { %v2145_v6 = vpop.eup %2144  ;;  %v904_v57 = vmul.f32 %v2779_v29, %v855_v41  ;;  %v874_v53 = vmul.f32 %v2772_v27, %v855_v41  ;;  %v963_v23 = vrot.slane %v2784_v39, 6 }
 0x413   : > { %v2791_v11 = vpop.eup %2146  ;;  %v964_v22 = vrot.slane %v2145_v6, 5 }
 0x414   : > { %v2793_v46 = vpop.eup %2148  ;;  %v911_v49 = vadd.f32 %v2724_v9, %v904_v57  ;;  %v2797_v60 = vadd.f32 %v2791_v11, %v874_v53 }
 0x415   : > { %v2799_v38 = vpop.eup %2150  ;;  %v965_v35 = vsel %vm576_vm4, %v964_v22, %v963_v23 }
 0x416   : > { %v930_v42 = vmul.f32 %v2793_v46, %v911_v49  ;;  %v960_v34 = vmul.f32 %v2799_v38, %v911_v49  ;;  %v2804_v55 = vpop.eup %2152  ;;  %v582_v49 = vmul.f32 1.442695, %v581_v17 }
 0x417   : > { %v2806_v26 = vpop.eup %2154 }
 0x418   : > { %v2809_v25 = vadd.f32 %v2804_v55, %v930_v42  ;;  %v967_v9 = vadd.f32 %v965_v35, %v960_v34  ;;  %v2811_v47 = vpop.eup %2156  ;;  %2160 = vpow2.f32 %v582_v49  ;;  %v585_v42 = vmul.f32 1.442695, %v584_v19 }
 0x419   : > { %3084 = vst [vmem:[#allocation9_spill] sm:$0xff] %v2811_v47  ;;  %v2815_v53 = vpop.eup %2158 }
 0x41a   : > { %v986_v41 = vmul.f32 %v2806_v26, %v967_v9  ;;  %v1016_v57 = vmul.f32 %v2811_v47, %v967_v9  ;;  %2162 = vpow2.f32 %v585_v42  ;;  %v1027_v9 = vunpack.c.0.s8 %v1026_v13 }
 0x41c   : > { %v2818_v23 = vadd.f32 %v2815_v53, %v986_v41  ;;  %v2820_v22 = vadd.f32 %v1021_v37, %v1016_v57  ;;  %v2828_v48 = vsub.s32 %v1027_v9, %v2348_v1 }
 0x425   : > { %v2161_v35 = vpop.eup %2160 }
 0x426   : > { %v587_v34 = vmul.f32 0.0, %v2161_v35 }
 0x427   : > { %v2163_v15 = vpop.eup %2162 }
 0x428   : > { %v593_v0 = vadd.f32 %v2163_v15, %v587_v34 }
 0x42a   : > { %2164 = vrcp.f32 %v593_v0 }
 0x42b   : > { %2166 = vrcp.f32 %v2731_v61 }
 0x42c   : > { %2168 = vrcp.f32 %v2750_v31 }
 0x42d   : > { %2170 = vrcp.f32 %v763_v20 }
 0x42e   : > { %2172 = vrcp.f32 %v2782_v12 }
 0x42f   : > { %2174 = vrcp.f32 %v2797_v60 }
 0x430   : > { %2176 = vrcp.f32 %v2809_v25 }
 0x431   : > { %2178 = vrcp.f32 %v2818_v23 }
 0x441   : > { %v619_v47 = vpop.permute.xlu1 %618 }
 0x442   : > { %v623_v41 = vmul.f32 %v2529_v54, %v619_v47  ;;  %v728_v37 = vmul.f32 %v2611_v16, %v619_v47  ;;  %v784_v19 = vmul.f32 %v2651_v2, %v619_v47  ;;  %v2831_v32 = vmul.f32 %v2746_v3, %v619_v47 }
 0x443   : > { %v674_v13 = vmul.f32 %v2581_v58, %v619_v47  ;;  %v840_v18 = vmul.f32 %v2764_v56, %v619_v47  ;;  %v896_v54 = vmul.f32 %v2700_v52, %v619_v47  ;;  %v952_v61 = vmul.f32 %v2145_v6, %v619_v47 }
 0x444   : > { %v589_v0 = vpop.permute.xlu0 %588  ;;  %v626_v16 = vrot.slane %v623_v41, 7  ;;  %v732_v57 = vrot.slane %v728_v37, 1  ;;  %v788_v2 = vrot.slane %v784_v19, 2  ;;  %v1012_v12 = vrot.slane %v2831_v32, 6 }
 0x445   : > { %v591_v31 = vmul.f32 %v2163_v15, %v589_v0  ;;  %v617_v17 = vpop.permute.xlu1 %616  ;;  %v900_v19 = vrot.slane %v896_v54, 4 }
 0x446   : > { %v622_v49 = vmul.f32 %v2548_v7, %v617_v17  ;;  %v673_v20 = vmul.f32 %v2565_v21, %v617_v17  ;;  %v727_v3 = vmul.f32 %v2606_v63, %v617_v17  ;;  %v783_v42 = vmul.f32 %v2648_v5, %v617_v17  ;;  %v2165_v7 = vpop.eup %2164 }
 0x447   : > { %v592_v35 = vadd.f32 %v591_v31, %v587_v34  ;;  %v839_v58 = vmul.f32 %v2761_v45, %v617_v17  ;;  %v895_v56 = vmul.f32 %v2693_v40, %v617_v17  ;;  %v951_v52 = vmul.f32 %v2784_v39, %v617_v17 }
 0x448   : > { %v649_v15 = vpop.permute.xlu0 %648  ;;  %v627_v6 = vsel %vm576_vm4, %v626_v16, %v622_v49  ;;  %v677_v47 = vrot.slane %v673_v20, 1  ;;  %v731_v9 = vrot.slane %v727_v3, 2  ;;  %v787_v41 = vrot.slane %v783_v42, 3 }
 0x449   : > { %v629_v21 = vadd.f32 %v627_v6, %v2695_v30  ;;  %v843_v37 = vrot.slane %v839_v58, 4  ;;  %v844_v63 = vrot.slane %v840_v18, 3  ;;  %v595_v5 = vmul.f32 %v2165_v7, %v592_v35  ;;  %v702_v31 = vpop.permute.xlu1 %701 }
 0x44a   : > { %v678_v34 = vsel %vm576_vm4, %v674_v13, %v677_v47  ;;  %v733_v45 = vsel %vm576_vm4, %v732_v57, %v731_v9  ;;  %v789_v40 = vsel %vm576_vm4, %v788_v2, %v787_v41  ;;  %v651_v0 = vmul.f32 %v2662_v62, %v649_v15  ;;  %v2167_v57 = vpop.eup %2166 }
 0x44b   : > { %v647_v39 = vmul.f32 %v2625_v4, %v629_v21  ;;  %v672_v16 = vmul.f32 %v2677_v33, %v629_v21  ;;  %v845_v49 = vsel %vm576_vm4, %v844_v63, %v843_v37  ;;  %v899_v30 = vrot.slane %v895_v56, 5  ;;  %v2169_v33 = vpop.eup %2168 }
 0x44c   : > { %v955_v20 = vrot.slane %v951_v52, 6  ;;  %v956_v18 = vrot.slane %v952_v61, 5  ;;  %v1007_v54 = vmul.f32 %v2738_v44, %v617_v17  ;;  %v1031_v2 = vrot.slane %v595_v5, %v2828_v48  ;;  %v2171_v17 = vpop.eup %2170  ;;  %v814_v7 = vpop.permute.xlu0 %813 }
 0x44d   : > { %v652_v3 = vadd.f32 %v651_v0, %v647_v39  ;;  %v680_v13 = vadd.f32 %v678_v34, %v672_v16  ;;  %v2856_v4 = vsel %vm576_vm4, %v900_v19, %v899_v30  ;;  %v704_v61 = vmul.f32 %v2713_v50, %v702_v31  ;;  %v758_v6 = vpop.permute.xlu1 %757 }
 0x44e   : > { %v2859_v62 = vsel %vm576_vm4, %v956_v18, %v955_v20  ;;  %v1011_v58 = vrot.slane %v1007_v54, 7  ;;  %v2867_v47 = vsub.s32 0, %v2348_v1  ;;  %v1032_v9 = vcombine.high %v1031_v2, %v1031_v2 }
 0x44f   : > { %v656_v42 = vmul.f32 %v2167_v57, %v652_v3  ;;  %v700_v35 = vmul.f32 %v2708_v8, %v680_v13  ;;  %v726_v44 = vmul.f32 %v2719_v10, %v680_v13  ;;  %v760_v37 = vmul.f32 %v2728_v51, %v758_v6  ;;  %v2173_v3 = vpop.eup %2172 }
 0x450   : > { %v2871_v8 = vsel %vm576_vm4, %v1012_v12, %v1011_v58  ;;  %v1039_v34 = vrot.slane %v1031_v2, %v2828_v48  ;;  %v816_v39 = vmul.f32 %v2776_v28, %v814_v7 }
 0x451   : > { %v1056_v56 = vrot.slane %v656_v42, %v2828_v48  ;;  %v705_v52 = vadd.f32 %v704_v61, %v700_v35  ;;  %v735_v15 = vadd.f32 %v733_v45, %v726_v44  ;;  %v1046_v45 = vrot.slane %v1032_v9, %v2828_v48  ;;  %v870_v30 = vpop.permute.xlu1 %869  ;;  %v926_v61 = vpop.permute.xlu0 %925 }
 0x452   : > { %v872_v2 = vmul.f32 %v2791_v11, %v870_v30 }
 0x453   : > { %v1057_v50 = vcombine.high %v1056_v56, %v1056_v56  ;;  %v1064_v10 = vrot.slane %v1056_v56, %v2828_v48  ;;  %v709_v41 = vmul.f32 %v2169_v33, %v705_v52  ;;  %v782_v32 = vmul.f32 %v2734_v36, %v735_v15  ;;  %v2175_v52 = vpop.eup %2174 }
 0x454   : > { %v756_v21 = vmul.f32 %v2726_v43, %v735_v15  ;;  %v2177_v7 = vpop.eup %2176 }
 0x455   : > { %v1071_v63 = vrot.slane %v1057_v50, %v2828_v48  ;;  %v1213_v60 = vrot.slane %v1064_v10, %v2867_v47  ;;  %v1079_v19 = vrot.slane %v709_v41, %v2828_v48  ;;  %v791_v5 = vadd.f32 %v789_v40, %v782_v32  ;;  %v982_v10 = vpop.permute.xlu1 %981 }
 0x456   : > { %v761_v36 = vadd.f32 %v760_v37, %v756_v21 }
 0x457   : > { %v1217_v43 = vrot.slane %v1071_v63, %v2867_v47  ;;  %v1080_v0 = vcombine.high %v1079_v19, %v1079_v19  ;;  %v1087_v51 = vrot.slane %v1079_v19, %v2828_v48  ;;  %v812_v25 = vmul.f32 %v2754_v24, %v791_v5 }
 0x458   : > { %v838_v31 = vmul.f32 %v2769_v59, %v791_v5  ;;  %v765_v16 = vmul.f32 %v2171_v17, %v761_v36  ;;  %v1280_v40 = vsel %vm454_vm2, %v1039_v34, %v1213_v60 }
 0x459   : > { %v1094_v20 = vrot.slane %v1080_v0, %v2828_v48  ;;  %v1223_v18 = vrot.slane %v1087_v51, %v2867_v47  ;;  %v817_v28 = vadd.f32 %v816_v39, %v812_v25  ;;  %v1281_v54 = vsel %vm454_vm2, %v1046_v45, %v1217_v43  ;;  %v3085_v43 = vld [vmem:[#allocation9_spill] sm:$0xff] }
 0x45a   : > { %v1102_v13 = vrot.slane %v765_v16, %v2828_v48  ;;  %v847_v57 = vadd.f32 %v845_v49, %v838_v31  ;;  %v2179_v31 = vpop.eup %2178 }
 0x45b   : > { %v1227_v24 = vrot.slane %v1094_v20, %v2867_v47  ;;  %v821_v59 = vmul.f32 %v2173_v3, %v817_v28  ;;  %v1283_v33 = vsel %vm1282_vm5, %v1280_v40, %v1223_v18 }
 0x45c   : > { %v1103_v42 = vcombine.high %v1102_v13, %v1102_v13  ;;  %v1110_v35 = vrot.slane %v1102_v13, %v2828_v48  ;;  %v894_v44 = vmul.f32 %v2779_v29, %v847_v57  ;;  %v868_v17 = vmul.f32 %v2772_v27, %v847_v57 }
 0x45d   : > { %v1125_v58 = vrot.slane %v821_v59, %v2828_v48  ;;  %v1284_v23 = vsel %vm1282_vm5, %v1281_v54, %v1227_v24  ;;  %v928_v29 = vmul.f32 %v2804_v55, %v926_v61 }
 0x45e   : > { %v1117_v49 = vrot.slane %v1103_v42, %v2828_v48  ;;  %v1233_v12 = vrot.slane %v1110_v35, %v2867_v47  ;;  %v903_v11 = vadd.f32 %v2856_v4, %v894_v44  ;;  %v873_v56 = vadd.f32 %v872_v2, %v868_v17 }
 0x45f   : > { %v1126_v15 = vcombine.high %v1125_v58, %v1125_v58  ;;  %v1133_v6 = vrot.slane %v1125_v58, %v2828_v48  ;;  %v1719_v4 = vrot.slane %v2633_v14, %v2828_v48  ;;  %v1697_v14 = vrot.slane %v2820_v22, %v2828_v48 }
 0x460   : > { %v1237_v27 = vrot.slane %v1117_v49, %v2867_v47  ;;  %v924_v9 = vmul.f32 %v2793_v46, %v903_v11  ;;  %v877_v50 = vmul.f32 %v2175_v52, %v873_v56  ;;  %v950_v41 = vmul.f32 %v2799_v38, %v903_v11 }
 0x461   : > { %v1140_v32 = vrot.slane %v1126_v15, %v2828_v48  ;;  %v1243_v21 = vrot.slane %v1133_v6, %v2867_v47  ;;  %v1286_v37 = vsel %vm1285_vm6, %v1283_v33, %v1233_v12  ;;  %v984_v38 = vmul.f32 %v2815_v53, %v982_v10 }
 0x462   : > { %v929_v55 = vadd.f32 %v928_v29, %v924_v9  ;;  %v1148_v63 = vrot.slane %v877_v50, %v2828_v48  ;;  %v959_v60 = vadd.f32 %v2859_v62, %v950_v41  ;;  %v1287_v46 = vsel %vm1285_vm6, %v1284_v23, %v1237_v27  ;;  %v3086_v27 = vld [vmem:[#allocation7_spill] sm:$0xff] }
 0x463   : > { %v1247_v19 = vrot.slane %v1140_v32, %v2867_v47  ;;  %v1289_v5 = vsel %vm1288_vm7, %v1286_v37, %v1243_v21  ;;  %v1720_v16 = vcombine.high %v1719_v4, %v1719_v4  ;;  %v1698_v40 = vcombine.high %v1697_v14, %v1697_v14  ;;  %v3088_v32 = vld [vmem:[#allocation8_spill] sm:$0xff] }
 0x464   : > { %v933_v34 = vmul.f32 %v2177_v7, %v929_v55  ;;  %v1149_v45 = vcombine.high %v1148_v63, %v1148_v63  ;;  %v1156_v39 = vrot.slane %v1148_v63, %v2828_v48  ;;  %v980_v36 = vmul.f32 %v2806_v26, %v959_v60 }
 0x465   : > { %v1006_v0 = vmul.f32 %v3085_v43, %v959_v60  ;;  %v1290_v62 = vsel %vm1288_vm7, %v1287_v46, %v1247_v19  ;;  %v1705_v3 = vrot.slane %v1697_v14, %v2828_v48  ;;  %v1727_v2 = vrot.slane %v1719_v4, %v2828_v48 }
 0x466   : > { %v1171_v51 = vrot.slane %v933_v34, %v2828_v48  ;;  %v1163_v53 = vrot.slane %v1149_v45, %v2828_v48  ;;  %v985_v25 = vadd.f32 %v984_v38, %v980_v36  ;;  %v1253_v22 = vrot.slane %v1156_v39, %v2867_v47  ;;  %v2192_v34 = vld [vmem:[#allocation2 + $0x8] sm:$0xff]  ;;  %v2193_v36 = vld [vmem:[#allocation2] sm:$0xff] }
 0x467   : > { %v1015_v30 = vadd.f32 %v2871_v8, %v1006_v0  ;;  %v1712_v35 = vrot.slane %v1698_v40, %v2828_v48  ;;  %v1734_v23 = vrot.slane %v1720_v16, %v2828_v48  ;;  %v1748_v52 = vrot.slane %v1705_v3, %v2867_v47  ;;  %v1465_v3 = vld [vmem:[%s2308_s19 + $0x60] sm:$0xff] }
 0x468   : > { %v1172_v20 = vcombine.high %v1171_v51, %v1171_v51  ;;  %v1179_v26 = vrot.slane %v1171_v51, %v2828_v48  ;;  %v989_v18 = vmul.f32 %v2179_v31, %v985_v25  ;;  %v1257_v28 = vrot.slane %v1163_v53, %v2867_v47 }
 0x469   : > { %v1674_v54 = vrot.slane %v1015_v30, %v2828_v48  ;;  %v1292_v13 = vsel %vm1291_vm8, %v1289_v5, %v1253_v22  ;;  %v1758_v6 = vrot.slane %v1727_v2, %v2867_v47  ;;  %v3087_v9 = vrot.slane %v3086_v27, 7  ;;  %v1459_v2 = vld [vmem:[%s2308_s19 + $0x30] sm:$0xff] }
 0x46a   : > { %v1194_v57 = vrot.slane %v989_v18, %v2828_v48  ;;  %v1186_v24 = vrot.slane %v1172_v20, %v2828_v48  ;;  %v1293_v8 = vsel %vm1291_vm8, %v1290_v62, %v1257_v28  ;;  %v1263_v59 = vrot.slane %v1179_v26, %v2867_v47  ;;  %v1468_v18 = vld [vmem:[%s2308_s19 + $0x78] sm:$0xff]  ;;  %v1467_v28 = vld [vmem:[%s2308_s19 + $0x70] sm:$0xff] }
 0x46b   : > { %v1675_v33 = vcombine.high %v1674_v54, %v1674_v54  ;;  %v1682_v42 = vrot.slane %v1674_v54, %v2828_v48  ;;  %v1752_v41 = vrot.slane %v1712_v35, %v2867_v47  ;;  %v1762_v4 = vrot.slane %v1734_v23, %v2867_v47  ;;  %v1466_v54 = vld [vmem:[%s2308_s19 + $0x68] sm:$0xff]  ;;  %1491 = vmatprep.subr.mxu1 %v1468_v18  ;;  %v1456_v35 = vld [vmem:[%s2308_s19 + $0x18] sm:$0xff] }
 0x46c   : > { %v1195_v61 = vcombine.high %v1194_v57, %v1194_v57  ;;  %v1267_v44 = vrot.slane %v1186_v24, %v2867_v47  ;;  %v1202_v17 = vrot.slane %v1194_v57, %v2828_v48  ;;  %v1295_v58 = vsel %vm1294_vm9, %v1292_v13, %v1263_v59  ;;  %1492 = vmatpush1.msra.mxu1 %v1467_v28  ;;  %v1464_v13 = vld [vmem:[%s2308_s19 + $0x58] sm:$0xff]  ;;  %v1463_v57 = vld [vmem:[%s2308_s19 + $0x50] sm:$0xff]  ;;  %v1462_v24 = vld [vmem:[%s2308_s19 + $0x48] sm:$0xff] }
 0x46d   : > { %v1689_v49 = vrot.slane %v1675_v33, %v2828_v48  ;;  %v1738_v12 = vrot.slane %v1682_v42, %v2867_v47  ;;  %v3089_v21 = vrot.slane %v3088_v32, 7  ;;  %1493 = vmatprep.subr.mxu1 %v1466_v54  ;;  %v1460_v59 = vld [vmem:[%s2308_s19 + $0x38] sm:$0xff]  ;;  %v1458_v33 = vld [vmem:[%s2308_s19 + $0x28] sm:$0xff]  ;;  %v1457_v42 = vld [vmem:[%s2308_s19 + $0x20] sm:$0xff] }
 0x46e   : > { %v1209_v11 = vrot.slane %v1195_v61, %v2828_v48  ;;  %v1296_v56 = vsel %vm1294_vm9, %v1293_v8, %v1267_v44  ;;  %v1273_v15 = vrot.slane %v1202_v17, %v2867_v47  ;;  %1494 = vmatpush1.msra.mxu1 %v1465_v3  ;;  %v1461_v8 = vld [vmem:[%s2308_s19 + $0x40] sm:$0xff]  ;;  %v1455_v61 = vld [vmem:[%s2308_s19 + $0x10] sm:$0xff]  ;;  %v1454_v44 = vld [vmem:[%s2308_s19 + $0x8] sm:$0xff] }
 0x46f   : > { %v1742_v29 = vrot.slane %v1689_v49, %v2867_v47  ;;  %v1769_v50 = vsel %vm454_vm2, %v3087_v9, %v1738_v12  ;;  %1495 = vmatprep.subr.mxu1 %v1464_v13  ;;  %v1557_v18 = vld [vmem:[%s2314_s22 + $0x8] sm:$0xff]  ;;  %v1556_v28 = vld [vmem:[%s2314_s22] sm:$0xff] }
 0x470   : > { %v1277_v10 = vrot.slane %v1209_v11, %v2867_v47  ;;  %v1771_v48 = vsel %vm1282_vm5, %v1769_v50, %v1748_v52  ;;  %v1298_v7 = vsel %vm1297_vm10, %v1295_v58, %v1273_v15  ;;  %1496 = vmatpush1.msra.mxu1 %v1463_v57  ;;  %v1431_v52 = vsub.s32 5, %v2348_v1  ;;  %v1453_v15 = vld [vmem:[%s2308_s19] sm:$0xff] }
 0x471   : > { %v1770_v37 = vsel %vm454_vm2, %v3089_v21, %v1742_v29  ;;  %v2966_v55 = vsel %vm1285_vm6, %v1771_v48, %v1758_v6  ;;  %1497 = vmatprep.subr.mxu1 %v1462_v24  ;;  %v2234_v6 = vmov 0.0   ;;  %v3090_v29 = vld [vmem:[#allocation6_spill] sm:$0xff]  ;;  %v1570_v48 = vld [vmem:[%s2314_s22 + $0x70] sm:$0xff] }
 0x472   : > { %v1299_v63 = vsel %vm1297_vm10, %v1296_v56, %v1277_v10  ;;  %v1772_v60 = vsel %vm1282_vm5, %v1770_v37, %v1752_v41  ;;  %1498 = vmatpush1.msra.mxu1 %v1461_v8  ;;  %v1425_v56 = vsub.s32 4, %v2348_v1  ;;  %1539 = vmatprep.mubr.f32.mxu1 %v2234_v6  ;;  %v1432_v10 = vrot.slane %v3090_v29, %v1431_v52  ;;  %v1571_v41 = vld [vmem:[%s2314_s22 + $0x78] sm:$0xff]  ;;  %v1569_v1 = vld [vmem:[%s2314_s22 + $0x68] sm:$0xff]  ;;  %v1568_v37 = vld [vmem:[%s2314_s22 + $0x60] sm:$0xff] }
 0x473   : > { %v2970_v46 = vsel %vm1285_vm6, %v1772_v60, %v1762_v4  ;;  %1499 = vmatprep.subr.mxu1 %v1460_v59  ;;  %2009 = vmatprep.subr.mxu0 %v1571_v41 }
 0x474   : > { %1500 = vmatpush1.msra.mxu1 %v1459_v2  ;;  %v1426_v27 = vrot.slane %v3090_v29, %v1425_v56 }
 0x475   : > { %1501 = vmatprep.subr.mxu1 %v1458_v33 }
 0x476   : > { %1502 = vmatpush1.msra.mxu1 %v1457_v42 }
 0x477   : > { %1503 = vmatprep.subr.mxu1 %v1456_v35 }
 0x478   : > { %1504 = vmatpush1.msra.mxu1 %v1455_v61 }
 0x479   : > { %v1305_v19 = vpop.permute.xlu1 %1304  ;;  %1505 = vmatprep.subr.mxu1 %v1454_v44 }
 0x47a   : > { %v1309_v38 = vmul.f32 %v1305_v19, %v1299_v63  ;;  %1506 = vmatpush1.msra.mxu1 %v1453_v15 }
 0x47c   : > { %v1303_v14 = vpop.permute.xlu0 %1302 }
 0x47d   : > { %v1308_v5 = vmul.f32 %v1303_v14, %v1298_v7 }
 0x47f   : > { %2006 = vmatprep.mubr.msk.f32.mxu0 %vm408_vm1, %v1308_v5 }
 0x480   : > { %2007 = vmatmul.mubr.msk.f32.vlgmr.msra.gmra.mxu0 %vm408_vm1, %v1309_v38  ;;  %v1567_v38 = vld [vmem:[%s2314_s22 + $0x58] sm:$0xff] }
 0x481   : > { %2010 = vmatpush3.msra.mxu0 %v1571_v41 }
 0x482   : > { %2011 = vmatprep.subr.mxu0 %v1570_v48 }
 0x483   : > { %2012 = vmatpush3.msra.mxu0 %v1570_v48 }
 0x484   : > { %2013 = vmatprep.subr.mxu0 %v1569_v1 }
 0x485   : > { %2014 = vmatpush3.msra.mxu0 %v1569_v1 }
 0x486   : > { %2015 = vmatprep.subr.mxu0 %v1568_v37 }
 0x487   : > { %2016 = vmatpush3.msra.mxu0 %v1568_v37 }
 0x488   : > { %2017 = vmatprep.subr.mxu0 %v1567_v38 }
 0x489   : > { %2018 = vmatpush3.msra.mxu0 %v1567_v38 }
 0x540   : > { %v2008_v47 = vpop.f32.mrf.mxu0 }
 0x541   : > { %v2974_v45 = vadd.f32 %v2192_v34, %v2008_v47  ;;  %v1566_v34 = vld [vmem:[%s2314_s22 + $0x50] sm:$0xff] }
 0x542   : > { %v1386_v39 = vpop.f32.mrf.mxu0  ;;  %2019 = vmatprep.subr.mxu0 %v1566_v34 }
 0x543   : > { %v2976_v43 = vadd.f32 %v2193_v36, %v1386_v39  ;;  %v1400_v0 = vsel %vm408_vm1, %v2974_v45, 0.0  ;;  %2020 = vmatpush3.msra.mxu0 %v1566_v34 }
 0x544   : > { %1401 = vadd.xlane.f32.xlu1 %v1400_v0  ;;  %v1565_v0 = vld [vmem:[%s2314_s22 + $0x48] sm:$0xff] }
 0x545   : > { %v1397_v62 = vsel %vm408_vm1, %v2976_v43, 0.0  ;;  %2021 = vmatprep.subr.mxu0 %v1565_v0 }
 0x546   : > { %1398 = vadd.xlane.f32.xlu0 %v1397_v62  ;;  %2022 = vmatpush3.msra.mxu0 %v1565_v0 }
 0x5cd   : > { %v1402_v51 = vpop.xlane.xlu1 %1401 }
 0x5ce   : > { %v1404_v53 = vmul.f32 0.03125, %v1402_v51  ;;  %v1564_v51 = vld [vmem:[%s2314_s22 + $0x40] sm:$0xff] }
 0x5cf   : > { %v1399_v25 = vpop.xlane.xlu0 %1398  ;;  %2023 = vmatprep.subr.mxu0 %v1564_v51 }
 0x5d0   : > { %v1403_v22 = vmul.f32 0.03125, %v1399_v25  ;;  %v2983_v31 = vsub.f32 %v2974_v45, %v1404_v53  ;;  %v1563_v53 = vld [vmem:[%s2314_s22 + $0x38] sm:$0xff]  ;;  %2024 = vmatpush3.msra.mxu0 %v1564_v51  ;;  %v1562_v25 = vld [vmem:[%s2314_s22 + $0x30] sm:$0xff] }
 0x5d1   : > { %2025 = vmatprep.subr.mxu0 %v1563_v53 }
 0x5d2   : > { %v1405_v16 = vsub.f32 %v2976_v43, %v1403_v22  ;;  %v1408_v20 = vmul.f32 %v2983_v31, %v2983_v31  ;;  %2026 = vmatpush3.msra.mxu0 %v1563_v53  ;;  %v1561_v22 = vld [vmem:[%s2314_s22 + $0x28] sm:$0xff] }
 0x5d3   : > { %2027 = vmatprep.subr.mxu0 %v1562_v25 }
 0x5d4   : > { %v1407_v30 = vmul.f32 %v1405_v16, %v1405_v16  ;;  %v1412_v26 = vsel %vm408_vm1, %v1408_v20, 0.0  ;;  %2028 = vmatpush3.msra.mxu0 %v1562_v25  ;;  %v1559_v20 = vld [vmem:[%s2314_s22 + $0x18] sm:$0xff] }
 0x5d5   : > { %2029 = vmatprep.subr.mxu0 %v1561_v22 }
 0x5d6   : > { %v1409_v40 = vsel %vm408_vm1, %v1407_v30, 0.0  ;;  %2030 = vmatpush3.msra.mxu0 %v1561_v22 }
 0x5d7   : > { %1410 = vadd.xlane.f32.xlu0 %v1409_v40 }
 0x5db   : > { %1413 = vadd.xlane.f32.xlu0 %v1412_v26  ;;  %v1558_v26 = vld [vmem:[%s2314_s22 + $0x10] sm:$0xff] }
 0x660   : > { %v1411_v17 = vpop.xlane.xlu0 %1410 }
 0x661   : > { %v1415_v58 = vmul.f32 0.03125, %v1411_v17 }
 0x663   : > { %v1417_v23 = vadd.f32 1e-05, %v1415_v58 }
 0x664   : > { %v1414_v49 = vpop.xlane.xlu0 %1413 }
 0x665   : > { %2180 = vrsqrt.f32 %v1417_v23  ;;  %v1416_v12 = vmul.f32 0.03125, %v1414_v49 }
 0x667   : > { %v1418_v11 = vadd.f32 1e-05, %v1416_v12 }
 0x669   : > { %2182 = vrsqrt.f32 %v1418_v11 }
 0x672   : > { %v2181_v9 = vpop.eup %2180 }
 0x673   : > { %v1421_v50 = vmul.f32 %v2181_v9, %v1405_v16 }
 0x675   : > { %v1427_v7 = vmul.f32 %v1426_v27, %v1421_v50 }
 0x676   : > { %v2183_v4 = vpop.eup %2182 }
 0x677   : > { %v1433_v32 = vadd.f32 %v1432_v10, %v1427_v7  ;;  %v1422_v21 = vmul.f32 %v2183_v4, %v2983_v31 }
 0x679   : > { %v1437_v63 = vrot.slane %v1433_v32, 7  ;;  %v1765_v60 = vrot.slane %v1433_v32, 3  ;;  %v1428_v19 = vmul.f32 %v1426_v27, %v1422_v21 }
 0x67b   : > { %v1441_v14 = vsel %vm454_vm2, 0.0, %v1437_v63  ;;  %v1775_v5 = vsel %vm1288_vm7, %v2966_v55, %v1765_v60  ;;  %v1434_v47 = vadd.f32 %v1432_v10, %v1428_v19 }
 0x67c   : > { %1778 = vst.msk [vmem:[%s2319_s29] sm:$0x1f] %vm1777_vm11, %v1775_v5  ;;  %1445 = vrot.lane.b32.xlu0 %v1441_v14, %s2230_s26 }
 0x67d   : > { %v1438_v39 = vrot.slane %v1434_v47, 7  ;;  %v1766_v36 = vrot.slane %v1434_v47, 3 }
 0x67f   : > { %v1442_v62 = vsel %vm454_vm2, 0.0, %v1438_v39  ;;  %v1776_v55 = vsel %vm1288_vm7, %v2970_v46, %v1766_v36  ;;  %v1560_v46 = vld [vmem:[%s2314_s22 + $0x20] sm:$0xff] }
 0x680   : > { %1779 = vst.msk [vmem:[%s2319_s29 + $0x8] sm:$0x1f] %vm1777_vm11, %v1776_v55  ;;  %1447 = vrot.lane.b32.xlu1 %v1442_v62, %s2230_s26  ;;  %2031 = vmatprep.subr.mxu0 %v1560_v46 }
 0x681   : > { %2032 = vmatpush3.msra.mxu0 %v1560_v46 }
 0x682   : > { %2033 = vmatprep.subr.mxu0 %v1559_v20 }
 0x683   : > { %2034 = vmatpush3.msra.mxu0 %v1559_v20 }
 0x684   : > { %2035 = vmatprep.subr.mxu0 %v1558_v26 }
 0x685   : > { %2036 = vmatpush3.msra.mxu0 %v1558_v26 }
 0x686   : > { %2037 = vmatprep.subr.mxu0 %v1557_v18 }
 0x687   : > { %2038 = vmatpush3.msra.mxu0 %v1557_v18 }
 0x688   : > { %2039 = vmatprep.subr.mxu0 %v1556_v28 }
 0x689   : > { %2040 = vmatpush3.msra.mxu0 %v1556_v28 }
 0x6ee   : > { %v1446_v31 = vpop.permute.xlu0 %1445 }
 0x6ef   : > { %v1451_v16 = vsel %vm408_vm1, %v1433_v32, %v1446_v31 }
 0x6f0   : > { %1932 = vmatmul.mubr.msk.f32.vlgmr.msra.gmra.mxu1 %vm475_vm3, %v1451_v16 }
 0x6f1   : > { %1545 = vmatprep.mubr.f32.mxu1 %v2234_v6 }
 0x6f2   : > { %v1448_v30 = vpop.permute.xlu1 %1447 }
 0x6f3   : > { %v1452_v40 = vsel %vm408_vm1, %v1434_v47, %v1448_v30 }
 0x6f4   : > { %1933 = vmatmul.mubr.msk.f32.gmra.mxu1 %vm475_vm3, %v1452_v40 }
 0x7b0   : > { %v1541_v54 = vpop.f32.mrf.mxu1 }
 0x7b1   : > { %v1552_v3 = vmax.f32 %v1541_v54, 0.0 }
 0x7b2   : > { %v1543_v13 = vpop.f32.mrf.mxu1 }
 0x7b3   : > { %v1554_v57 = vmul.f32 %v1552_v3, %v1552_v3  ;;  %v1934_v42 = vmul.f32 -1.442695, %v1543_v13 }
 0x7b4   : > { %v1547_v24 = vpop.f32.mrf.mxu1 }
 0x7b5   : > { %v1553_v8 = vmax.f32 %v1547_v24, 0.0  ;;  %2041 = vmatprep.mubr.f32.mxu0 %v1554_v57 }
 0x7b6   : > { %v1549_v2 = vpop.f32.mrf.mxu1 }
 0x7b7   : > { %v1555_v59 = vmul.f32 %v1553_v8, %v1553_v8  ;;  %v1935_v33 = vmul.f32 -1.442695, %v1549_v2 }
 0x7b9   : > { %2042 = vmatmul.mubr.f32.vlgmr.msra.gmra.mxu0 %v1555_v59  ;;  %2184 = vpow2.f32 %v1935_v33 }
 0x7ba   : > { %2186 = vpow2.f32 %v1934_v42 }
 0x7c6   : > { %v2185_v35 = vpop.eup %2184 }
 0x7c7   : > { %v2187_v61 = vpop.eup %2186  ;;  %v1654_v44 = vadd.f32 1.0, %v2185_v35 }
 0x7c8   : > { %v1653_v17 = vadd.f32 1.0, %v2187_v61 }
 0x7c9   : > { %2188 = vrcp.f32 %v1654_v44 }
 0x7ca   : > { %2190 = vrcp.f32 %v1653_v17 }
 0x7d6   : > { %v2189_v58 = vpop.eup %2188 }
 0x7d7   : > { %v2191_v12 = vpop.eup %2190 }
 0x879   : > { %v2043_v23 = vpop.f32.mrf.mxu0 }
 0x87a   : > { %v1660_v49 = vmul.f32 %v2189_v58, %v2043_v23 }
 0x87b   : > { %v1638_v11 = vpop.f32.mrf.mxu0 }
 0x87c   : > { %v1662_v56 = vadd.f32 %v1660_v49, %v2974_v45  ;;  %v1659_v52 = vmul.f32 %v2191_v12, %v1638_v11 }
 0x87e   : > { %1664 = vst.msk [vmem:[#allocation2 + $0x8] sm:$0xff] %vm408_vm1, %v1662_v56  ;;  %1666 = vst.msk [vmem:[#allocation3 + $0x8] sm:$0xff] %vm408_vm1, %v1662_v56  ;;  %v1661_v15 = vadd.f32 %v1659_v52, %v2976_v43 }
 0x880   : > { %1663 = vst.msk [vmem:[#allocation2] sm:$0xff] %vm408_vm1, %v1661_v15  ;;  %1665 = vst.msk [vmem:[#allocation3] sm:$0xff] %vm408_vm1, %v1661_v15 }
 0x881   : > { %2207 = shalt.err (!%p2204_p12)
}
 0x882   : > { %s2236_s16 = smov 128   ;;  %s2237_s17 = smov 8  }
 0x883   : > { %2045 = dma.vmem_to_hbm [thread:$0]  (%p2048_p5), %s1792_s14, 256, %s3072_s6, [#allocation4], %s2236_s16, %s2236_s16, %s2237_s17  }
 0x884   : > { %2223 = dma.done.wait (%p2048_p5), [#allocation4], 256  }
 0x885   : > { %2225 = vsyncadd (%p2048_p5), [#allocation4], 4294967040 }
 0x886 PF: > { %s19_s24 = sadd.s32 1, %s2228_s24  }
 0x887   : > { %p16_p13 = scmp.ge.s32.totalorder %s19_s24, 4  }
 0x889   :  { %18 = sbr.rel (!%p16_p13) target bundleno = 1 (0x1), region = 99 }
 0x88e   :  { %1818 = vsyncpa [#allocation4], 1 }
 0x88f   :  { %1820 = vsyncpa [#allocation4 + $0x1], 1 }

</bundles_post_ra>
